<compile_context>
chip_gen: v6e
topology: v6e:2x2x1
jax: 0.10.0
libtpu: 0.0.40
codegen_flags: <defaults>
</compile_context>

<pallas_src>
import math
import functools

import jax
import jax.numpy as jnp
from jax.experimental import pallas as pl
from jax.experimental.pallas import tpu as pltpu


CFG = dict(
    vocab_size=100,
    hidden=32,
    n_layers=2,
    n_heads=4,
    head_dim=8,
    intermediate=64,
    max_pos=66,
    pad_token_id=1,
    ln_eps=1e-5,
)

SLAB_WIDTH = 128
ROWS_PER_LAYER = 7   # ao_b, ln1_g, ln1_b, fc1_b, fc2_b, ln2_g, ln2_b


# ------------------------------ fused kernel -------------------------------

def _fused_forward_kernel(emb_ref, mask_ref, slab_ref,
                          qkv_w_ref, qkv_b_ref, ao_w_ref,
                          fc1_w_ref, fc2_w_ref,
                          pool_w_ref, cls_w_ref,
                          out_ref,
                          *, n_layers, n_heads, head_dim, inter, eps):
    H = n_heads * head_dim
    S = emb_ref.shape[1]
    f32 = jnp.float32
    bf16 = jnp.bfloat16

    slab = slab_ref[...]                              # (rows, 128) f32

    def vec(row, width):                              # (1, width) lane vector
        return slab[row:row + 1, 0:width]

    def layernorm(x, g, b):
        mean = jnp.mean(x, axis=-1, keepdims=True)
        var = jnp.mean((x - mean) * (x - mean), axis=-1, keepdims=True)
        return (x - mean) * jax.lax.rsqrt(var + eps) * g + b

    def gelu(x):
        # TODO(synk): HF RoBERTa uses exact erf GELU; tanh approximation here.
        c = math.sqrt(2.0 / math.pi)
        return 0.5 * x * (1.0 + jnp.tanh(c * (x + 0.044715 * x * x * x)))

    # Additive attention bias built in-kernel from the (1, S) key mask
    # (1 = real token, 0 = padding); broadcasts over heads and query rows.
    # Safe: every sequence has >= 1 real token, so no all-masked softmax row.
    neg_bias = (1.0 - mask_ref[0]) * (-1e30)          # (1, S)

    # embeddings -> LayerNorm
    h = layernorm(emb_ref[0].astype(f32), vec(0, H), vec(1, H))   # (S, H)

    for l in range(n_layers):
        base = 2 + l * ROWS_PER_LAYER
        x = h

        # Head-batched fused QKV projection; softmax scale already folded into
        # the Q slice of the weights/bias at param-prep time.
        xb = jnp.broadcast_to(x, (n_heads, S, H)).astype(bf16)
        qkv = jnp.einsum('hsk,hkd->hsd', xb, qkv_w_ref[l],
                         preferred_element_type=f32) + qkv_b_ref[l]  # (nh,S,3hd)
        q = qkv[:, :, 0:head_dim]
        k = qkv[:, :, head_dim:2 * head_dim]
        v = qkv[:, :, 2 * head_dim:3 * head_dim]

        # Attention for all heads in one batched matmul pair.
        s = jnp.einsum('hqd,hkd->hqk', q.astype(bf16), k.astype(bf16),
                       preferred_element_type=f32)                   # (nh,S,S)
        s = s + neg_bias
        s = s - jnp.max(s, axis=-1, keepdims=True)
        p = jnp.exp(s)
        p = p / jnp.sum(p, axis=-1, keepdims=True)
        ctx = jnp.einsum('hqk,hkd->hqd', p.astype(bf16), v.astype(bf16),
                         preferred_element_type=f32)                 # (nh,S,hd)

        # Output projection: per-head (hd, H) weights, reduced over heads.
        attn = jnp.einsum('hsd,hdo->hso', ctx.astype(bf16), ao_w_ref[l],
                          preferred_element_type=f32)                # (nh,S,H)
        attn = jnp.sum(attn, axis=0) + vec(base + 0, H)              # (S, H)
        h1 = layernorm(attn + x, vec(base + 1, H), vec(base + 2, H))

        # GELU FFN with fused residual + LayerNorm.
        ff = gelu(jnp.dot(h1.astype(bf16), fc1_w_ref[l],
                          preferred_element_type=f32) + vec(base + 3, inter))
        ff = jnp.dot(ff.astype(bf16), fc2_w_ref[l],
                     preferred_element_type=f32) + vec(base + 4, H)
        h = layernorm(ff + h1, vec(base + 5, H), vec(base + 6, H))

    pool_row = 2 + n_layers * ROWS_PER_LAYER
    # pooler: tanh(Linear(<s> token)) -> classification head (1 logit)
    pooled = jnp.tanh(jnp.dot(h[0:1, :].astype(bf16), pool_w_ref[...],
                              preferred_element_type=f32) + vec(pool_row, H))
    logit = jnp.dot(pooled.astype(bf16), cls_w_ref[...],
                    preferred_element_type=f32) + vec(pool_row + 1, 1)  # (1,1)
    out_ref[0] = logit.astype(out_ref.dtype)


# ------------------------- model config / parameters -----------------------

def init_params(key, cfg):
    H, I, L = cfg["hidden"], cfg["intermediate"], cfg["n_layers"]
    ks = iter(jax.random.split(key, 32))

    def nrm(shape, std=1.0):
        return std * jax.random.normal(next(ks), shape, jnp.float32)

    p = {}
    # nn.Embedding modules are NOT touched by _randomize_weights -> small init.
    p["word_emb"] = nrm((cfg["vocab_size"], H), 0.02)
    p["pos_emb"] = nrm((cfg["max_pos"], H), 0.02)
    p["type_emb"] = nrm((1, H), 0.02)
    # _randomize_weights: LayerNorm weight = 1.0, bias = 10.0
    p["emb_ln_g"] = jnp.ones((H,), jnp.float32)
    p["emb_ln_b"] = jnp.full((H,), 10.0, jnp.float32)

    # _randomize_weights: nn.Linear weight ~ N(0, 1); biases keep small values.
    p["qkv_w"] = nrm((L, H, 3 * H), 1.0)      # q|k|v packed on the out axis
    p["qkv_b"] = nrm((L, 3 * H), 0.02)
    p["ao_w"] = nrm((L, H, H), 1.0)
    p["ao_b"] = nrm((L, H), 0.02)
    p["ln1_g"] = jnp.ones((L, H), jnp.float32)
    p["ln1_b"] = jnp.full((L, H), 10.0, jnp.float32)
    p["fc1_w"] = nrm((L, H, I), 1.0)
    p["fc1_b"] = nrm((L, I), 0.02)
    p["fc2_w"] = nrm((L, I, H), 1.0)
    p["fc2_b"] = nrm((L, H), 0.02)
    p["ln2_g"] = jnp.ones((L, H), jnp.float32)
    p["ln2_b"] = jnp.full((L, H), 10.0, jnp.float32)

    # pooler is an nn.Linear inside roberta -> weight ~ N(0, 1)
    p["pool_w"] = nrm((H, H), 1.0)
    p["pool_b"] = nrm((H,), 0.02)
    # classification_head is outside roberta -> default nn.Linear init scale
    bound = 1.0 / math.sqrt(H)
    p["cls_w"] = jax.random.uniform(next(ks), (H, 1), jnp.float32, -bound, bound)
    p["cls_b"] = jax.random.uniform(next(ks), (1,), jnp.float32, -bound, bound)
    return p


def prepare_kernel_params(p, cfg):
    """Pre-arrange weights in kernel layout (head-major, scale folded, bf16)."""
    H, I, L = cfg["hidden"], cfg["intermediate"], cfg["n_layers"]
    nh, hd = cfg["n_heads"], cfg["head_dim"]
    scale = 1.0 / math.sqrt(hd)

    def split_heads_w(w):                 # (L, H, H) cols h*hd+d -> (L, nh, H, hd)
        return w.reshape(L, H, nh, hd).transpose(0, 2, 1, 3)

    q_w, k_w, v_w = (p["qkv_w"][:, :, i * H:(i + 1) * H] for i in range(3))
    qkv_wh = jnp.concatenate(
        [split_heads_w(q_w) * scale,      # fold softmax scale into Q weights
         split_heads_w(k_w), split_heads_w(v_w)], axis=-1)    # (L, nh, H, 3hd)

    def split_heads_b(b):                 # (L, H) -> (L, nh, 1, hd)
        return b.reshape(L, nh, hd)[:, :, None, :]

    q_b, k_b, v_b = (p["qkv_b"][:, i * H:(i + 1) * H] for i in range(3))
    qkv_bh = jnp.concatenate(
        [split_heads_b(q_b) * scale, split_heads_b(k_b), split_heads_b(v_b)],
        axis=-1)                                              # (L, nh, 1, 3hd)

    ao_wh = p["ao_w"].reshape(L, nh, hd, H)                   # rows were h*hd+d

    # Pack every tiny bias / LayerNorm vector into one (rows, 128) f32 slab.
    rows = 2 + ROWS_PER_LAYER * L + 2
    slab = jnp.zeros((rows, SLAB_WIDTH), jnp.float32)

    def put(s, row, v):
        return s.at[row, 0:v.shape[0]].set(v)

    slab = put(slab, 0, p["emb_ln_g"])
    slab = put(slab, 1, p["emb_ln_b"])
    for l in range(L):
        base = 2 + ROWS_PER_LAYER * l
        slab = put(slab, base + 0, p["ao_b"][l])
        slab = put(slab, base + 1, p["ln1_g"][l])
        slab = put(slab, base + 2, p["ln1_b"][l])
        slab = put(slab, base + 3, p["fc1_b"][l])
        slab = put(slab, base + 4, p["fc2_b"][l])
        slab = put(slab, base + 5, p["ln2_g"][l])
        slab = put(slab, base + 6, p["ln2_b"][l])
    slab = put(slab, 2 + ROWS_PER_LAYER * L, p["pool_b"])
    slab = put(slab, 2 + ROWS_PER_LAYER * L + 1, p["cls_b"])

    bf16 = jnp.bfloat16
    return dict(
        slab=slab,
        qkv_w=qkv_wh.astype(bf16), qkv_b=qkv_bh,
        ao_w=ao_wh.astype(bf16),
        fc1_w=p["fc1_w"].astype(bf16), fc2_w=p["fc2_w"].astype(bf16),
        pool_w=p["pool_w"].astype(bf16), cls_w=p["cls_w"].astype(bf16),
    )


# ------------------------------- forward pass -------------------------------

def distil_rb_rand_forward(kparams, emb_params, input_ids, attention_mask, cfg):
    B, S = input_ids.shape
    H = cfg["hidden"]
    pad = cfg["pad_token_id"]

    # RoBERTa position ids: cumsum over non-pad tokens, offset by padding_idx.
    tok_mask = (input_ids != pad).astype(jnp.int32)
    position_ids = jnp.cumsum(tok_mask, axis=1) * tok_mask + pad

    # TODO(synk): tiny embedding-table gathers stay in plain JAX; everything
    # downstream of the embedding sum runs inside the fused Pallas kernel.
    emb = (emb_params["word_emb"][input_ids]
           + emb_params["pos_emb"][position_ids]
           + emb_params["type_emb"][0][None, None, :]).astype(jnp.float32)  # (B,S,H)

    mask3 = attention_mask.astype(jnp.float32).reshape(B, 1, S)

    kernel = functools.partial(
        _fused_forward_kernel,
        n_layers=cfg["n_layers"], n_heads=cfg["n_heads"],
        head_dim=cfg["head_dim"], inter=cfg["intermediate"], eps=cfg["ln_eps"])

    def resident(a):  # weights: same block every grid step -> stay in VMEM
        return pl.BlockSpec(a.shape, lambda b, _nd=a.ndim: (0,) * _nd)

    kp = kparams
    in_specs = [
        pl.BlockSpec((1, S, H), lambda b: (b, 0, 0)),     # per-batch activations
        pl.BlockSpec((1, 1, S), lambda b: (b, 0, 0)),     # per-batch key mask
        resident(kp["slab"]),
        resident(kp["qkv_w"]), resident(kp["qkv_b"]), resident(kp["ao_w"]),
        resident(kp["fc1_w"]), resident(kp["fc2_w"]),
        resident(kp["pool_w"]), resident(kp["cls_w"]),
    ]

    logits = pl.pallas_call(
        kernel,
        grid=(B,),
        in_specs=in_specs,
        out_specs=pl.BlockSpec((1, 1, 1), lambda b: (b, 0, 0)),
        out_shape=jax.ShapeDtypeStruct((B, 1, 1), jnp.float32),
        compiler_params=pltpu.CompilerParams(
            dimension_semantics=("parallel",)),
    )(emb, mask3, kp["slab"], kp["qkv_w"], kp["qkv_b"], kp["ao_w"],
      kp["fc1_w"], kp["fc2_w"], kp["pool_w"], kp["cls_w"])
    return logits.reshape(B, 1)


# ---------------------------------- main ------------------------------------

if __name__ == "__main__":
    cfg = CFG
    key = jax.random.PRNGKey(0)
    pkey, dkey = jax.random.split(key)
    params = init_params(pkey, cfg)
    kparams = prepare_kernel_params(params, cfg)

    B, S = 2, 8
    input_ids = jax.random.randint(dkey, (B, S), 3, cfg["vocab_size"],
                                   dtype=jnp.int32)
    # pad the tail of the second sequence to exercise the attention mask
    input_ids = input_ids.at[1, 5:].set(cfg["pad_token_id"])
    attention_mask = (input_ids != cfg["pad_token_id"]).astype(jnp.int32)

    logits = distil_rb_rand_forward(kparams, params, input_ids,
                                    attention_mask, cfg)
    logits = jax.block_until_ready(logits)

    assert logits.shape == (B, 1), logits.shape
    assert bool(jnp.all(jnp.isfinite(logits)))
    print("KERNEL_OK")
</pallas_src>

<mosaic_0001>
module attributes {stable_mosaic.version = 11 : i64} {
  func.func @_fused_forward_kernel(%arg0: i32, %arg1: memref<1x8x32xf32, #tpu.memory_space<vmem>>, %arg2: memref<1x1x8xf32, #tpu.memory_space<vmem>>, %arg3: memref<18x128xf32, #tpu.memory_space<vmem>>, %arg4: memref<2x4x32x24xbf16, #tpu.memory_space<vmem>>, %arg5: memref<2x4x1x24xf32, #tpu.memory_space<vmem>>, %arg6: memref<2x4x8x32xbf16, #tpu.memory_space<vmem>>, %arg7: memref<2x32x64xbf16, #tpu.memory_space<vmem>>, %arg8: memref<2x64x32xbf16, #tpu.memory_space<vmem>>, %arg9: memref<32x32xbf16, #tpu.memory_space<vmem>>, %arg10: memref<32x1xbf16, #tpu.memory_space<vmem>>, %arg11: memref<1x1x1xf32, #tpu.memory_space<vmem>>) attributes {dimension_semantics = [#tpu.dimension_semantics<parallel>], iteration_bounds = array<i64: 2>, scalar_prefetch = 0 : i64, scratch_operands = 0 : i64, tpu.core_type = #tpu.core_type<tc>, window_params = [{transform_indices = @transform_0, window_bounds = array<i64: 1, 8, 32>}, {transform_indices = @transform_1, window_bounds = array<i64: 1, 1, 8>}, {pipeline_mode = #tpu.pipeline_mode<synchronous>, transform_indices = @transform_2, window_bounds = array<i64: 18, 128>}, {pipeline_mode = #tpu.pipeline_mode<synchronous>, transform_indices = @transform_3, window_bounds = array<i64: 2, 4, 32, 24>}, {pipeline_mode = #tpu.pipeline_mode<synchronous>, transform_indices = @transform_4, window_bounds = array<i64: 2, 4, 1, 24>}, {pipeline_mode = #tpu.pipeline_mode<synchronous>, transform_indices = @transform_5, window_bounds = array<i64: 2, 4, 8, 32>}, {pipeline_mode = #tpu.pipeline_mode<synchronous>, transform_indices = @transform_6, window_bounds = array<i64: 2, 32, 64>}, {pipeline_mode = #tpu.pipeline_mode<synchronous>, transform_indices = @transform_7, window_bounds = array<i64: 2, 64, 32>}, {pipeline_mode = #tpu.pipeline_mode<synchronous>, transform_indices = @transform_8, window_bounds = array<i64: 32, 32>}, {pipeline_mode = #tpu.pipeline_mode<synchronous>, transform_indices = @transform_9, window_bounds = array<i64: 32, 1>}, {transform_indices = @transform_10, window_bounds = array<i64: 1, 1, 1>}]} {
    %c0 = arith.constant 0 : index
    %c0_0 = arith.constant 0 : index
    %0 = vector.load %arg3[%c0, %c0_0] : memref<18x128xf32, #tpu.memory_space<vmem>>, vector<18x128xf32>
    %c0_1 = arith.constant 0 : index
    %c0_2 = arith.constant 0 : index
    %c0_3 = arith.constant 0 : index
    %1 = vector.load %arg2[%c0_1, %c0_2, %c0_3] : memref<1x1x8xf32, #tpu.memory_space<vmem>>, vector<1x1x8xf32>
    %2 = vector.shape_cast %1 : vector<1x1x8xf32> to vector<1x8xf32>
    %cst = arith.constant 1.000000e+00 : f32
    %3 = vector.broadcast %cst : f32 to vector<1x8xf32>
    %4 = arith.subf %3, %2 : vector<1x8xf32>
    %cst_4 = arith.constant -1.000000e+30 : f32
    %5 = vector.broadcast %cst_4 : f32 to vector<1x8xf32>
    %6 = arith.mulf %4, %5 : vector<1x8xf32>
    %c0_5 = arith.constant 0 : index
    %c0_6 = arith.constant 0 : index
    %c0_7 = arith.constant 0 : index
    %7 = vector.load %arg1[%c0_5, %c0_6, %c0_7] : memref<1x8x32xf32, #tpu.memory_space<vmem>>, vector<1x8x32xf32>
    %8 = vector.shape_cast %7 : vector<1x8x32xf32> to vector<8x32xf32>
    %9 = vector.extract_strided_slice %0 {offsets = [0, 0], sizes = [1, 32], strides = [1, 1]} : vector<18x128xf32> to vector<1x32xf32>
    %10 = vector.extract_strided_slice %0 {offsets = [1, 0], sizes = [1, 32], strides = [1, 1]} : vector<18x128xf32> to vector<1x32xf32>
    %cst_8 = arith.constant dense<0.000000e+00> : vector<8xf32>
    %11 = vector.multi_reduction <add>, %8, %cst_8 [1] : vector<8x32xf32> to vector<8xf32>
    %12 = vector.shape_cast %11 : vector<8xf32> to vector<8x1xf32>
    %cst_9 = arith.constant 3.200000e+01 : f32
    %13 = vector.broadcast %cst_9 : f32 to vector<8x1xf32>
    %14 = arith.divf %12, %13 : vector<8x1xf32>
    %15 = vector.broadcast %14 : vector<8x1xf32> to vector<8x32xf32>
    %16 = arith.subf %8, %15 : vector<8x32xf32>
    %17 = vector.broadcast %14 : vector<8x1xf32> to vector<8x32xf32>
    %18 = arith.subf %8, %17 : vector<8x32xf32>
    %19 = arith.mulf %16, %18 : vector<8x32xf32>
    %cst_10 = arith.constant dense<0.000000e+00> : vector<8xf32>
    %20 = vector.multi_reduction <add>, %19, %cst_10 [1] : vector<8x32xf32> to vector<8xf32>
    %21 = vector.shape_cast %20 : vector<8xf32> to vector<8x1xf32>
    %cst_11 = arith.constant 3.200000e+01 : f32
    %22 = vector.broadcast %cst_11 : f32 to vector<8x1xf32>
    %23 = arith.divf %21, %22 : vector<8x1xf32>
    %24 = vector.broadcast %14 : vector<8x1xf32> to vector<8x32xf32>
    %25 = arith.subf %8, %24 : vector<8x32xf32>
    %cst_12 = arith.constant 9.99999974E-6 : f32
    %26 = vector.broadcast %cst_12 : f32 to vector<8x1xf32>
    %27 = arith.addf %23, %26 : vector<8x1xf32>
    %28 = math.rsqrt %27 : vector<8x1xf32>
    %29 = vector.broadcast %28 : vector<8x1xf32> to vector<8x32xf32>
    %30 = arith.mulf %25, %29 : vector<8x32xf32>
    %31 = vector.broadcast %9 : vector<1x32xf32> to vector<8x32xf32>
    %32 = arith.mulf %30, %31 : vector<8x32xf32>
    %33 = vector.broadcast %10 : vector<1x32xf32> to vector<8x32xf32>
    %34 = arith.addf %32, %33 : vector<8x32xf32>
    %35 = vector.shape_cast %34 : vector<8x32xf32> to vector<1x8x32xf32>
    %36 = vector.broadcast %35 : vector<1x8x32xf32> to vector<4x8x32xf32>
    %37 = arith.truncf %36 : vector<4x8x32xf32> to vector<4x8x32xbf16>
    %c0_13 = arith.constant 0 : index
    %c0_14 = arith.constant 0 : index
    %c0_15 = arith.constant 0 : index
    %c0_16 = arith.constant 0 : index
    %38 = vector.load %arg4[%c0_13, %c0_14, %c0_15, %c0_16] : memref<2x4x32x24xbf16, #tpu.memory_space<vmem>>, vector<1x4x32x24xbf16>
    %39 = vector.shape_cast %38 : vector<1x4x32x24xbf16> to vector<4x32x24xbf16>
    "tpu.trace_start"() <{level = 10 : i32, message = "hsk,hkd->hsd"}> : () -> ()
    %cst_17 = arith.constant dense<0.000000e+00> : vector<4x8x24xf32>
    %40 = tpu.matmul %37, %39, %cst_17 {dimension_numbers = #tpu.dot_dimension_numbers<[2], [1], [1], [2], [0, 0, 0, 1, 1, 2], [0], [0]>} : vector<4x8x32xbf16>, vector<4x32x24xbf16>, vector<4x8x24xf32> -> vector<4x8x24xf32>
    "tpu.trace_stop"() : () -> ()
    %c0_18 = arith.constant 0 : index
    %c0_19 = arith.constant 0 : index
    %c0_20 = arith.constant 0 : index
    %c0_21 = arith.constant 0 : index
    %41 = vector.load %arg5[%c0_18, %c0_19, %c0_20, %c0_21] : memref<2x4x1x24xf32, #tpu.memory_space<vmem>>, vector<1x4x1x24xf32>
    %42 = vector.shape_cast %41 : vector<1x4x1x24xf32> to vector<4x1x24xf32>
    %43 = vector.broadcast %42 : vector<4x1x24xf32> to vector<4x8x24xf32>
    %44 = arith.addf %40, %43 : vector<4x8x24xf32>
    %45 = vector.extract_strided_slice %44 {offsets = [0, 0, 0], sizes = [4, 8, 8], strides = [1, 1, 1]} : vector<4x8x24xf32> to vector<4x8x8xf32>
    %46 = vector.extract_strided_slice %44 {offsets = [0, 0, 8], sizes = [4, 8, 8], strides = [1, 1, 1]} : vector<4x8x24xf32> to vector<4x8x8xf32>
    %47 = vector.extract_strided_slice %44 {offsets = [0, 0, 16], sizes = [4, 8, 8], strides = [1, 1, 1]} : vector<4x8x24xf32> to vector<4x8x8xf32>
    %48 = arith.truncf %45 : vector<4x8x8xf32> to vector<4x8x8xbf16>
    %49 = arith.truncf %46 : vector<4x8x8xf32> to vector<4x8x8xbf16>
    "tpu.trace_start"() <{level = 10 : i32, message = "hqd,hkd->hqk"}> : () -> ()
    %cst_22 = arith.constant dense<0.000000e+00> : vector<4x8x8xf32>
    %50 = tpu.matmul %48, %49, %cst_22 {dimension_numbers = #tpu.dot_dimension_numbers<[2], [2], [1], [1], [0, 0, 0, 1, 1, 1], [0], [0]>} : vector<4x8x8xbf16>, vector<4x8x8xbf16>, vector<4x8x8xf32> -> vector<4x8x8xf32>
    "tpu.trace_stop"() : () -> ()
    %51 = vector.shape_cast %6 : vector<1x8xf32> to vector<1x1x8xf32>
    %52 = vector.broadcast %51 : vector<1x1x8xf32> to vector<4x8x8xf32>
    %53 = arith.addf %50, %52 : vector<4x8x8xf32>
    %cst_23 = arith.constant dense<0xFF800000> : vector<4x8xf32>
    %54 = vector.multi_reduction <maximumf>, %53, %cst_23 [2] : vector<4x8x8xf32> to vector<4x8xf32>
    %55 = vector.shape_cast %54 : vector<4x8xf32> to vector<4x8x1xf32>
    %56 = vector.broadcast %55 : vector<4x8x1xf32> to vector<4x8x8xf32>
    %57 = arith.subf %53, %56 : vector<4x8x8xf32>
    %58 = math.exp %57 : vector<4x8x8xf32>
    %cst_24 = arith.constant dense<0.000000e+00> : vector<4x8xf32>
    %59 = vector.multi_reduction <add>, %58, %cst_24 [2] : vector<4x8x8xf32> to vector<4x8xf32>
    %60 = vector.shape_cast %59 : vector<4x8xf32> to vector<4x8x1xf32>
    %61 = vector.broadcast %60 : vector<4x8x1xf32> to vector<4x8x8xf32>
    %62 = arith.divf %58, %61 : vector<4x8x8xf32>
    %63 = arith.truncf %62 : vector<4x8x8xf32> to vector<4x8x8xbf16>
    %64 = arith.truncf %47 : vector<4x8x8xf32> to vector<4x8x8xbf16>
    "tpu.trace_start"() <{level = 10 : i32, message = "hqk,hkd->hqd"}> : () -> ()
    %cst_25 = arith.constant dense<0.000000e+00> : vector<4x8x8xf32>
    %65 = tpu.matmul %63, %64, %cst_25 {dimension_numbers = #tpu.dot_dimension_numbers<[2], [1], [1], [2], [0, 0, 0, 1, 1, 2], [0], [0]>} : vector<4x8x8xbf16>, vector<4x8x8xbf16>, vector<4x8x8xf32> -> vector<4x8x8xf32>
    "tpu.trace_stop"() : () -> ()
    %66 = arith.truncf %65 : vector<4x8x8xf32> to vector<4x8x8xbf16>
    %c0_26 = arith.constant 0 : index
    %c0_27 = arith.constant 0 : index
    %c0_28 = arith.constant 0 : index
    %c0_29 = arith.constant 0 : index
    %67 = vector.load %arg6[%c0_26, %c0_27, %c0_28, %c0_29] : memref<2x4x8x32xbf16, #tpu.memory_space<vmem>>, vector<1x4x8x32xbf16>
    %68 = vector.shape_cast %67 : vector<1x4x8x32xbf16> to vector<4x8x32xbf16>
    "tpu.trace_start"() <{level = 10 : i32, message = "hsd,hdo->hso"}> : () -> ()
    %cst_30 = arith.constant dense<0.000000e+00> : vector<4x8x32xf32>
    %69 = tpu.matmul %66, %68, %cst_30 {dimension_numbers = #tpu.dot_dimension_numbers<[2], [1], [1], [2], [0, 0, 0, 1, 1, 2], [0], [0]>} : vector<4x8x8xbf16>, vector<4x8x32xbf16>, vector<4x8x32xf32> -> vector<4x8x32xf32>
    "tpu.trace_stop"() : () -> ()
    %cst_31 = arith.constant dense<0.000000e+00> : vector<8x32xf32>
    %70 = vector.multi_reduction <add>, %69, %cst_31 [0] : vector<4x8x32xf32> to vector<8x32xf32>
    %71 = vector.extract_strided_slice %0 {offsets = [2, 0], sizes = [1, 32], strides = [1, 1]} : vector<18x128xf32> to vector<1x32xf32>
    %72 = vector.broadcast %71 : vector<1x32xf32> to vector<8x32xf32>
    %73 = arith.addf %70, %72 : vector<8x32xf32>
    %74 = arith.addf %73, %34 : vector<8x32xf32>
    %75 = vector.extract_strided_slice %0 {offsets = [3, 0], sizes = [1, 32], strides = [1, 1]} : vector<18x128xf32> to vector<1x32xf32>
    %76 = vector.extract_strided_slice %0 {offsets = [4, 0], sizes = [1, 32], strides = [1, 1]} : vector<18x128xf32> to vector<1x32xf32>
    %cst_32 = arith.constant dense<0.000000e+00> : vector<8xf32>
    %77 = vector.multi_reduction <add>, %74, %cst_32 [1] : vector<8x32xf32> to vector<8xf32>
    %78 = vector.shape_cast %77 : vector<8xf32> to vector<8x1xf32>
    %cst_33 = arith.constant 3.200000e+01 : f32
    %79 = vector.broadcast %cst_33 : f32 to vector<8x1xf32>
    %80 = arith.divf %78, %79 : vector<8x1xf32>
    %81 = vector.broadcast %80 : vector<8x1xf32> to vector<8x32xf32>
    %82 = arith.subf %74, %81 : vector<8x32xf32>
    %83 = vector.broadcast %80 : vector<8x1xf32> to vector<8x32xf32>
    %84 = arith.subf %74, %83 : vector<8x32xf32>
    %85 = arith.mulf %82, %84 : vector<8x32xf32>
    %cst_34 = arith.constant dense<0.000000e+00> : vector<8xf32>
    %86 = vector.multi_reduction <add>, %85, %cst_34 [1] : vector<8x32xf32> to vector<8xf32>
    %87 = vector.shape_cast %86 : vector<8xf32> to vector<8x1xf32>
    %cst_35 = arith.constant 3.200000e+01 : f32
    %88 = vector.broadcast %cst_35 : f32 to vector<8x1xf32>
    %89 = arith.divf %87, %88 : vector<8x1xf32>
    %90 = vector.broadcast %80 : vector<8x1xf32> to vector<8x32xf32>
    %91 = arith.subf %74, %90 : vector<8x32xf32>
    %cst_36 = arith.constant 9.99999974E-6 : f32
    %92 = vector.broadcast %cst_36 : f32 to vector<8x1xf32>
    %93 = arith.addf %89, %92 : vector<8x1xf32>
    %94 = math.rsqrt %93 : vector<8x1xf32>
    %95 = vector.broadcast %94 : vector<8x1xf32> to vector<8x32xf32>
    %96 = arith.mulf %91, %95 : vector<8x32xf32>
    %97 = vector.broadcast %75 : vector<1x32xf32> to vector<8x32xf32>
    %98 = arith.mulf %96, %97 : vector<8x32xf32>
    %99 = vector.broadcast %76 : vector<1x32xf32> to vector<8x32xf32>
    %100 = arith.addf %98, %99 : vector<8x32xf32>
    %101 = arith.truncf %100 : vector<8x32xf32> to vector<8x32xbf16>
    %c0_37 = arith.constant 0 : index
    %c0_38 = arith.constant 0 : index
    %c0_39 = arith.constant 0 : index
    %102 = vector.load %arg7[%c0_37, %c0_38, %c0_39] : memref<2x32x64xbf16, #tpu.memory_space<vmem>>, vector<1x32x64xbf16>
    %103 = vector.shape_cast %102 : vector<1x32x64xbf16> to vector<32x64xbf16>
    %cst_40 = arith.constant dense<0.000000e+00> : vector<8x64xf32>
    %104 = tpu.matmul %101, %103, %cst_40 {dimension_numbers = #tpu.dot_dimension_numbers<[1], [0], [0], [1], [0, 0, 1, 1], [], []>} : vector<8x32xbf16>, vector<32x64xbf16>, vector<8x64xf32> -> vector<8x64xf32>
    %105 = vector.extract_strided_slice %0 {offsets = [5, 0], sizes = [1, 64], strides = [1, 1]} : vector<18x128xf32> to vector<1x64xf32>
    %106 = vector.broadcast %105 : vector<1x64xf32> to vector<8x64xf32>
    %107 = arith.addf %104, %106 : vector<8x64xf32>
    %cst_41 = arith.constant 5.000000e-01 : f32
    %108 = vector.broadcast %cst_41 : f32 to vector<8x64xf32>
    %109 = arith.mulf %108, %107 : vector<8x64xf32>
    %cst_42 = arith.constant 4.471500e-02 : f32
    %110 = vector.broadcast %cst_42 : f32 to vector<8x64xf32>
    %111 = arith.mulf %110, %107 : vector<8x64xf32>
    %112 = arith.mulf %111, %107 : vector<8x64xf32>
    %113 = arith.mulf %112, %107 : vector<8x64xf32>
    %114 = arith.addf %107, %113 : vector<8x64xf32>
    %cst_43 = arith.constant 0.797884583 : f32
    %115 = vector.broadcast %cst_43 : f32 to vector<8x64xf32>
    %116 = arith.mulf %115, %114 : vector<8x64xf32>
    %117 = math.tanh %116 : vector<8x64xf32>
    %cst_44 = arith.constant 1.000000e+00 : f32
    %118 = vector.broadcast %cst_44 : f32 to vector<8x64xf32>
    %119 = arith.addf %118, %117 : vector<8x64xf32>
    %120 = arith.mulf %109, %119 : vector<8x64xf32>
    %121 = arith.truncf %120 : vector<8x64xf32> to vector<8x64xbf16>
    %c0_45 = arith.constant 0 : index
    %c0_46 = arith.constant 0 : index
    %c0_47 = arith.constant 0 : index
    %122 = vector.load %arg8[%c0_45, %c0_46, %c0_47] : memref<2x64x32xbf16, #tpu.memory_space<vmem>>, vector<1x64x32xbf16>
    %123 = vector.shape_cast %122 : vector<1x64x32xbf16> to vector<64x32xbf16>
    %cst_48 = arith.constant dense<0.000000e+00> : vector<8x32xf32>
    %124 = tpu.matmul %121, %123, %cst_48 {dimension_numbers = #tpu.dot_dimension_numbers<[1], [0], [0], [1], [0, 0, 1, 1], [], []>} : vector<8x64xbf16>, vector<64x32xbf16>, vector<8x32xf32> -> vector<8x32xf32>
    %125 = vector.extract_strided_slice %0 {offsets = [6, 0], sizes = [1, 32], strides = [1, 1]} : vector<18x128xf32> to vector<1x32xf32>
    %126 = vector.broadcast %125 : vector<1x32xf32> to vector<8x32xf32>
    %127 = arith.addf %124, %126 : vector<8x32xf32>
    %128 = arith.addf %127, %100 : vector<8x32xf32>
    %129 = vector.extract_strided_slice %0 {offsets = [7, 0], sizes = [1, 32], strides = [1, 1]} : vector<18x128xf32> to vector<1x32xf32>
    %130 = vector.extract_strided_slice %0 {offsets = [8, 0], sizes = [1, 32], strides = [1, 1]} : vector<18x128xf32> to vector<1x32xf32>
    %cst_49 = arith.constant dense<0.000000e+00> : vector<8xf32>
    %131 = vector.multi_reduction <add>, %128, %cst_49 [1] : vector<8x32xf32> to vector<8xf32>
    %132 = vector.shape_cast %131 : vector<8xf32> to vector<8x1xf32>
    %cst_50 = arith.constant 3.200000e+01 : f32
    %133 = vector.broadcast %cst_50 : f32 to vector<8x1xf32>
    %134 = arith.divf %132, %133 : vector<8x1xf32>
    %135 = vector.broadcast %134 : vector<8x1xf32> to vector<8x32xf32>
    %136 = arith.subf %128, %135 : vector<8x32xf32>
    %137 = vector.broadcast %134 : vector<8x1xf32> to vector<8x32xf32>
    %138 = arith.subf %128, %137 : vector<8x32xf32>
    %139 = arith.mulf %136, %138 : vector<8x32xf32>
    %cst_51 = arith.constant dense<0.000000e+00> : vector<8xf32>
    %140 = vector.multi_reduction <add>, %139, %cst_51 [1] : vector<8x32xf32> to vector<8xf32>
    %141 = vector.shape_cast %140 : vector<8xf32> to vector<8x1xf32>
    %cst_52 = arith.constant 3.200000e+01 : f32
    %142 = vector.broadcast %cst_52 : f32 to vector<8x1xf32>
    %143 = arith.divf %141, %142 : vector<8x1xf32>
    %144 = vector.broadcast %134 : vector<8x1xf32> to vector<8x32xf32>
    %145 = arith.subf %128, %144 : vector<8x32xf32>
    %cst_53 = arith.constant 9.99999974E-6 : f32
    %146 = vector.broadcast %cst_53 : f32 to vector<8x1xf32>
    %147 = arith.addf %143, %146 : vector<8x1xf32>
    %148 = math.rsqrt %147 : vector<8x1xf32>
    %149 = vector.broadcast %148 : vector<8x1xf32> to vector<8x32xf32>
    %150 = arith.mulf %145, %149 : vector<8x32xf32>
    %151 = vector.broadcast %129 : vector<1x32xf32> to vector<8x32xf32>
    %152 = arith.mulf %150, %151 : vector<8x32xf32>
    %153 = vector.broadcast %130 : vector<1x32xf32> to vector<8x32xf32>
    %154 = arith.addf %152, %153 : vector<8x32xf32>
    %155 = vector.shape_cast %154 : vector<8x32xf32> to vector<1x8x32xf32>
    %156 = vector.broadcast %155 : vector<1x8x32xf32> to vector<4x8x32xf32>
    %157 = arith.truncf %156 : vector<4x8x32xf32> to vector<4x8x32xbf16>
    %c1 = arith.constant 1 : index
    %c0_54 = arith.constant 0 : index
    %c0_55 = arith.constant 0 : index
    %c0_56 = arith.constant 0 : index
    %158 = vector.load %arg4[%c1, %c0_54, %c0_55, %c0_56] : memref<2x4x32x24xbf16, #tpu.memory_space<vmem>>, vector<1x4x32x24xbf16>
    %159 = vector.shape_cast %158 : vector<1x4x32x24xbf16> to vector<4x32x24xbf16>
    "tpu.trace_start"() <{level = 10 : i32, message = "hsk,hkd->hsd"}> : () -> ()
    %cst_57 = arith.constant dense<0.000000e+00> : vector<4x8x24xf32>
    %160 = tpu.matmul %157, %159, %cst_57 {dimension_numbers = #tpu.dot_dimension_numbers<[2], [1], [1], [2], [0, 0, 0, 1, 1, 2], [0], [0]>} : vector<4x8x32xbf16>, vector<4x32x24xbf16>, vector<4x8x24xf32> -> vector<4x8x24xf32>
    "tpu.trace_stop"() : () -> ()
    %c1_58 = arith.constant 1 : index
    %c0_59 = arith.constant 0 : index
    %c0_60 = arith.constant 0 : index
    %c0_61 = arith.constant 0 : index
    %161 = vector.load %arg5[%c1_58, %c0_59, %c0_60, %c0_61] : memref<2x4x1x24xf32, #tpu.memory_space<vmem>>, vector<1x4x1x24xf32>
    %162 = vector.shape_cast %161 : vector<1x4x1x24xf32> to vector<4x1x24xf32>
    %163 = vector.broadcast %162 : vector<4x1x24xf32> to vector<4x8x24xf32>
    %164 = arith.addf %160, %163 : vector<4x8x24xf32>
    %165 = vector.extract_strided_slice %164 {offsets = [0, 0, 0], sizes = [4, 8, 8], strides = [1, 1, 1]} : vector<4x8x24xf32> to vector<4x8x8xf32>
    %166 = vector.extract_strided_slice %164 {offsets = [0, 0, 8], sizes = [4, 8, 8], strides = [1, 1, 1]} : vector<4x8x24xf32> to vector<4x8x8xf32>
    %167 = vector.extract_strided_slice %164 {offsets = [0, 0, 16], sizes = [4, 8, 8], strides = [1, 1, 1]} : vector<4x8x24xf32> to vector<4x8x8xf32>
    %168 = arith.truncf %165 : vector<4x8x8xf32> to vector<4x8x8xbf16>
    %169 = arith.truncf %166 : vector<4x8x8xf32> to vector<4x8x8xbf16>
    "tpu.trace_start"() <{level = 10 : i32, message = "hqd,hkd->hqk"}> : () -> ()
    %cst_62 = arith.constant dense<0.000000e+00> : vector<4x8x8xf32>
    %170 = tpu.matmul %168, %169, %cst_62 {dimension_numbers = #tpu.dot_dimension_numbers<[2], [2], [1], [1], [0, 0, 0, 1, 1, 1], [0], [0]>} : vector<4x8x8xbf16>, vector<4x8x8xbf16>, vector<4x8x8xf32> -> vector<4x8x8xf32>
    "tpu.trace_stop"() : () -> ()
    %171 = vector.shape_cast %6 : vector<1x8xf32> to vector<1x1x8xf32>
    %172 = vector.broadcast %171 : vector<1x1x8xf32> to vector<4x8x8xf32>
    %173 = arith.addf %170, %172 : vector<4x8x8xf32>
    %cst_63 = arith.constant dense<0xFF800000> : vector<4x8xf32>
    %174 = vector.multi_reduction <maximumf>, %173, %cst_63 [2] : vector<4x8x8xf32> to vector<4x8xf32>
    %175 = vector.shape_cast %174 : vector<4x8xf32> to vector<4x8x1xf32>
    %176 = vector.broadcast %175 : vector<4x8x1xf32> to vector<4x8x8xf32>
    %177 = arith.subf %173, %176 : vector<4x8x8xf32>
    %178 = math.exp %177 : vector<4x8x8xf32>
    %cst_64 = arith.constant dense<0.000000e+00> : vector<4x8xf32>
    %179 = vector.multi_reduction <add>, %178, %cst_64 [2] : vector<4x8x8xf32> to vector<4x8xf32>
    %180 = vector.shape_cast %179 : vector<4x8xf32> to vector<4x8x1xf32>
    %181 = vector.broadcast %180 : vector<4x8x1xf32> to vector<4x8x8xf32>
    %182 = arith.divf %178, %181 : vector<4x8x8xf32>
    %183 = arith.truncf %182 : vector<4x8x8xf32> to vector<4x8x8xbf16>
    %184 = arith.truncf %167 : vector<4x8x8xf32> to vector<4x8x8xbf16>
    "tpu.trace_start"() <{level = 10 : i32, message = "hqk,hkd->hqd"}> : () -> ()
    %cst_65 = arith.constant dense<0.000000e+00> : vector<4x8x8xf32>
    %185 = tpu.matmul %183, %184, %cst_65 {dimension_numbers = #tpu.dot_dimension_numbers<[2], [1], [1], [2], [0, 0, 0, 1, 1, 2], [0], [0]>} : vector<4x8x8xbf16>, vector<4x8x8xbf16>, vector<4x8x8xf32> -> vector<4x8x8xf32>
    "tpu.trace_stop"() : () -> ()
    %186 = arith.truncf %185 : vector<4x8x8xf32> to vector<4x8x8xbf16>
    %c1_66 = arith.constant 1 : index
    %c0_67 = arith.constant 0 : index
    %c0_68 = arith.constant 0 : index
    %c0_69 = arith.constant 0 : index
    %187 = vector.load %arg6[%c1_66, %c0_67, %c0_68, %c0_69] : memref<2x4x8x32xbf16, #tpu.memory_space<vmem>>, vector<1x4x8x32xbf16>
    %188 = vector.shape_cast %187 : vector<1x4x8x32xbf16> to vector<4x8x32xbf16>
    "tpu.trace_start"() <{level = 10 : i32, message = "hsd,hdo->hso"}> : () -> ()
    %cst_70 = arith.constant dense<0.000000e+00> : vector<4x8x32xf32>
    %189 = tpu.matmul %186, %188, %cst_70 {dimension_numbers = #tpu.dot_dimension_numbers<[2], [1], [1], [2], [0, 0, 0, 1, 1, 2], [0], [0]>} : vector<4x8x8xbf16>, vector<4x8x32xbf16>, vector<4x8x32xf32> -> vector<4x8x32xf32>
    "tpu.trace_stop"() : () -> ()
    %cst_71 = arith.constant dense<0.000000e+00> : vector<8x32xf32>
    %190 = vector.multi_reduction <add>, %189, %cst_71 [0] : vector<4x8x32xf32> to vector<8x32xf32>
    %191 = vector.extract_strided_slice %0 {offsets = [9, 0], sizes = [1, 32], strides = [1, 1]} : vector<18x128xf32> to vector<1x32xf32>
    %192 = vector.broadcast %191 : vector<1x32xf32> to vector<8x32xf32>
    %193 = arith.addf %190, %192 : vector<8x32xf32>
    %194 = arith.addf %193, %154 : vector<8x32xf32>
    %195 = vector.extract_strided_slice %0 {offsets = [10, 0], sizes = [1, 32], strides = [1, 1]} : vector<18x128xf32> to vector<1x32xf32>
    %196 = vector.extract_strided_slice %0 {offsets = [11, 0], sizes = [1, 32], strides = [1, 1]} : vector<18x128xf32> to vector<1x32xf32>
    %cst_72 = arith.constant dense<0.000000e+00> : vector<8xf32>
    %197 = vector.multi_reduction <add>, %194, %cst_72 [1] : vector<8x32xf32> to vector<8xf32>
    %198 = vector.shape_cast %197 : vector<8xf32> to vector<8x1xf32>
    %cst_73 = arith.constant 3.200000e+01 : f32
    %199 = vector.broadcast %cst_73 : f32 to vector<8x1xf32>
    %200 = arith.divf %198, %199 : vector<8x1xf32>
    %201 = vector.broadcast %200 : vector<8x1xf32> to vector<8x32xf32>
    %202 = arith.subf %194, %201 : vector<8x32xf32>
    %203 = vector.broadcast %200 : vector<8x1xf32> to vector<8x32xf32>
    %204 = arith.subf %194, %203 : vector<8x32xf32>
    %205 = arith.mulf %202, %204 : vector<8x32xf32>
    %cst_74 = arith.constant dense<0.000000e+00> : vector<8xf32>
    %206 = vector.multi_reduction <add>, %205, %cst_74 [1] : vector<8x32xf32> to vector<8xf32>
    %207 = vector.shape_cast %206 : vector<8xf32> to vector<8x1xf32>
    %cst_75 = arith.constant 3.200000e+01 : f32
    %208 = vector.broadcast %cst_75 : f32 to vector<8x1xf32>
    %209 = arith.divf %207, %208 : vector<8x1xf32>
    %210 = vector.broadcast %200 : vector<8x1xf32> to vector<8x32xf32>
    %211 = arith.subf %194, %210 : vector<8x32xf32>
    %cst_76 = arith.constant 9.99999974E-6 : f32
    %212 = vector.broadcast %cst_76 : f32 to vector<8x1xf32>
    %213 = arith.addf %209, %212 : vector<8x1xf32>
    %214 = math.rsqrt %213 : vector<8x1xf32>
    %215 = vector.broadcast %214 : vector<8x1xf32> to vector<8x32xf32>
    %216 = arith.mulf %211, %215 : vector<8x32xf32>
    %217 = vector.broadcast %195 : vector<1x32xf32> to vector<8x32xf32>
    %218 = arith.mulf %216, %217 : vector<8x32xf32>
    %219 = vector.broadcast %196 : vector<1x32xf32> to vector<8x32xf32>
    %220 = arith.addf %218, %219 : vector<8x32xf32>
    %221 = arith.truncf %220 : vector<8x32xf32> to vector<8x32xbf16>
    %c1_77 = arith.constant 1 : index
    %c0_78 = arith.constant 0 : index
    %c0_79 = arith.constant 0 : index
    %222 = vector.load %arg7[%c1_77, %c0_78, %c0_79] : memref<2x32x64xbf16, #tpu.memory_space<vmem>>, vector<1x32x64xbf16>
    %223 = vector.shape_cast %222 : vector<1x32x64xbf16> to vector<32x64xbf16>
    %cst_80 = arith.constant dense<0.000000e+00> : vector<8x64xf32>
    %224 = tpu.matmul %221, %223, %cst_80 {dimension_numbers = #tpu.dot_dimension_numbers<[1], [0], [0], [1], [0, 0, 1, 1], [], []>} : vector<8x32xbf16>, vector<32x64xbf16>, vector<8x64xf32> -> vector<8x64xf32>
    %225 = vector.extract_strided_slice %0 {offsets = [12, 0], sizes = [1, 64], strides = [1, 1]} : vector<18x128xf32> to vector<1x64xf32>
    %226 = vector.broadcast %225 : vector<1x64xf32> to vector<8x64xf32>
    %227 = arith.addf %224, %226 : vector<8x64xf32>
    %cst_81 = arith.constant 5.000000e-01 : f32
    %228 = vector.broadcast %cst_81 : f32 to vector<8x64xf32>
    %229 = arith.mulf %228, %227 : vector<8x64xf32>
    %cst_82 = arith.constant 4.471500e-02 : f32
    %230 = vector.broadcast %cst_82 : f32 to vector<8x64xf32>
    %231 = arith.mulf %230, %227 : vector<8x64xf32>
    %232 = arith.mulf %231, %227 : vector<8x64xf32>
    %233 = arith.mulf %232, %227 : vector<8x64xf32>
    %234 = arith.addf %227, %233 : vector<8x64xf32>
    %cst_83 = arith.constant 0.797884583 : f32
    %235 = vector.broadcast %cst_83 : f32 to vector<8x64xf32>
    %236 = arith.mulf %235, %234 : vector<8x64xf32>
    %237 = math.tanh %236 : vector<8x64xf32>
    %cst_84 = arith.constant 1.000000e+00 : f32
    %238 = vector.broadcast %cst_84 : f32 to vector<8x64xf32>
    %239 = arith.addf %238, %237 : vector<8x64xf32>
    %240 = arith.mulf %229, %239 : vector<8x64xf32>
    %241 = arith.truncf %240 : vector<8x64xf32> to vector<8x64xbf16>
    %c1_85 = arith.constant 1 : index
    %c0_86 = arith.constant 0 : index
    %c0_87 = arith.constant 0 : index
    %242 = vector.load %arg8[%c1_85, %c0_86, %c0_87] : memref<2x64x32xbf16, #tpu.memory_space<vmem>>, vector<1x64x32xbf16>
    %243 = vector.shape_cast %242 : vector<1x64x32xbf16> to vector<64x32xbf16>
    %cst_88 = arith.constant dense<0.000000e+00> : vector<8x32xf32>
    %244 = tpu.matmul %241, %243, %cst_88 {dimension_numbers = #tpu.dot_dimension_numbers<[1], [0], [0], [1], [0, 0, 1, 1], [], []>} : vector<8x64xbf16>, vector<64x32xbf16>, vector<8x32xf32> -> vector<8x32xf32>
    %245 = vector.extract_strided_slice %0 {offsets = [13, 0], sizes = [1, 32], strides = [1, 1]} : vector<18x128xf32> to vector<1x32xf32>
    %246 = vector.broadcast %245 : vector<1x32xf32> to vector<8x32xf32>
    %247 = arith.addf %244, %246 : vector<8x32xf32>
    %248 = arith.addf %247, %220 : vector<8x32xf32>
    %249 = vector.extract_strided_slice %0 {offsets = [14, 0], sizes = [1, 32], strides = [1, 1]} : vector<18x128xf32> to vector<1x32xf32>
    %250 = vector.extract_strided_slice %0 {offsets = [15, 0], sizes = [1, 32], strides = [1, 1]} : vector<18x128xf32> to vector<1x32xf32>
    %cst_89 = arith.constant dense<0.000000e+00> : vector<8xf32>
    %251 = vector.multi_reduction <add>, %248, %cst_89 [1] : vector<8x32xf32> to vector<8xf32>
    %252 = vector.shape_cast %251 : vector<8xf32> to vector<8x1xf32>
    %cst_90 = arith.constant 3.200000e+01 : f32
    %253 = vector.broadcast %cst_90 : f32 to vector<8x1xf32>
    %254 = arith.divf %252, %253 : vector<8x1xf32>
    %255 = vector.broadcast %254 : vector<8x1xf32> to vector<8x32xf32>
    %256 = arith.subf %248, %255 : vector<8x32xf32>
    %257 = vector.broadcast %254 : vector<8x1xf32> to vector<8x32xf32>
    %258 = arith.subf %248, %257 : vector<8x32xf32>
    %259 = arith.mulf %256, %258 : vector<8x32xf32>
    %cst_91 = arith.constant dense<0.000000e+00> : vector<8xf32>
    %260 = vector.multi_reduction <add>, %259, %cst_91 [1] : vector<8x32xf32> to vector<8xf32>
    %261 = vector.shape_cast %260 : vector<8xf32> to vector<8x1xf32>
    %cst_92 = arith.constant 3.200000e+01 : f32
    %262 = vector.broadcast %cst_92 : f32 to vector<8x1xf32>
    %263 = arith.divf %261, %262 : vector<8x1xf32>
    %264 = vector.broadcast %254 : vector<8x1xf32> to vector<8x32xf32>
    %265 = arith.subf %248, %264 : vector<8x32xf32>
    %cst_93 = arith.constant 9.99999974E-6 : f32
    %266 = vector.broadcast %cst_93 : f32 to vector<8x1xf32>
    %267 = arith.addf %263, %266 : vector<8x1xf32>
    %268 = math.rsqrt %267 : vector<8x1xf32>
    %269 = vector.broadcast %268 : vector<8x1xf32> to vector<8x32xf32>
    %270 = arith.mulf %265, %269 : vector<8x32xf32>
    %271 = vector.broadcast %249 : vector<1x32xf32> to vector<8x32xf32>
    %272 = arith.mulf %270, %271 : vector<8x32xf32>
    %273 = vector.broadcast %250 : vector<1x32xf32> to vector<8x32xf32>
    %274 = arith.addf %272, %273 : vector<8x32xf32>
    %275 = vector.extract_strided_slice %274 {offsets = [0, 0], sizes = [1, 32], strides = [1, 1]} : vector<8x32xf32> to vector<1x32xf32>
    %276 = arith.truncf %275 : vector<1x32xf32> to vector<1x32xbf16>
    %c0_94 = arith.constant 0 : index
    %c0_95 = arith.constant 0 : index
    %277 = vector.load %arg9[%c0_94, %c0_95] : memref<32x32xbf16, #tpu.memory_space<vmem>>, vector<32x32xbf16>
    %cst_96 = arith.constant dense<0.000000e+00> : vector<1x32xf32>
    %278 = tpu.matmul %276, %277, %cst_96 {dimension_numbers = #tpu.dot_dimension_numbers<[1], [0], [0], [1], [0, 0, 1, 1], [], []>} : vector<1x32xbf16>, vector<32x32xbf16>, vector<1x32xf32> -> vector<1x32xf32>
    %279 = vector.extract_strided_slice %0 {offsets = [16, 0], sizes = [1, 32], strides = [1, 1]} : vector<18x128xf32> to vector<1x32xf32>
    %280 = arith.addf %278, %279 : vector<1x32xf32>
    %281 = math.tanh %280 : vector<1x32xf32>
    %282 = arith.truncf %281 : vector<1x32xf32> to vector<1x32xbf16>
    %c0_97 = arith.constant 0 : index
    %c0_98 = arith.constant 0 : index
    %283 = vector.load %arg10[%c0_97, %c0_98] : memref<32x1xbf16, #tpu.memory_space<vmem>>, vector<32x1xbf16>
    %cst_99 = arith.constant dense<0.000000e+00> : vector<1x1xf32>
    %284 = tpu.matmul %282, %283, %cst_99 {dimension_numbers = #tpu.dot_dimension_numbers<[1], [0], [0], [1], [0, 0, 1, 1], [], []>} : vector<1x32xbf16>, vector<32x1xbf16>, vector<1x1xf32> -> vector<1x1xf32>
    %285 = vector.extract_strided_slice %0 {offsets = [17, 0], sizes = [1, 1], strides = [1, 1]} : vector<18x128xf32> to vector<1x1xf32>
    %286 = arith.addf %284, %285 : vector<1x1xf32>
    %c0_100 = arith.constant 0 : index
    %c0_101 = arith.constant 0 : index
    %c0_102 = arith.constant 0 : index
    %287 = vector.load %arg11[%c0_100, %c0_101, %c0_102] : memref<1x1x1xf32, #tpu.memory_space<vmem>>, vector<1x1x1xf32>
    %288 = vector.shape_cast %287 : vector<1x1x1xf32> to vector<1x1xf32>
    %289 = vector.shape_cast %286 : vector<1x1xf32> to vector<1x1x1xf32>
    tpu.vector_store %arg11[%c0_100, %c0_101, %c0_102], %289 {strides = array<i32>} : memref<1x1x1xf32, #tpu.memory_space<vmem>>, vector<1x1x1xf32>,
    return
  }
  func.func @transform_0(%arg0: i32) -> (i32, i32, i32) {
    %c0_i32 = arith.constant 0 : i32
    %c0_i32_0 = arith.constant 0 : i32
    %c0_i32_1 = arith.constant 0 : i32
    return %arg0, %c0_i32, %c0_i32_0 : i32, i32, i32
  }
  func.func @transform_1(%arg0: i32) -> (i32, i32, i32) {
    %c0_i32 = arith.constant 0 : i32
    %c0_i32_0 = arith.constant 0 : i32
    %c0_i32_1 = arith.constant 0 : i32
    return %arg0, %c0_i32, %c0_i32_0 : i32, i32, i32
  }
  func.func @transform_2(%arg0: i32) -> (i32, i32) {
    %c0_i32 = arith.constant 0 : i32
    %c0_i32_0 = arith.constant 0 : i32
    %c0_i32_1 = arith.constant 0 : i32
    return %c0_i32, %c0_i32_0 : i32, i32
  }
  func.func @transform_3(%arg0: i32) -> (i32, i32, i32, i32) {
    %c0_i32 = arith.constant 0 : i32
    %c0_i32_0 = arith.constant 0 : i32
    %c0_i32_1 = arith.constant 0 : i32
    %c0_i32_2 = arith.constant 0 : i32
    %c0_i32_3 = arith.constant 0 : i32
    return %c0_i32, %c0_i32_0, %c0_i32_1, %c0_i32_2 : i32, i32, i32, i32
  }
  func.func @transform_4(%arg0: i32) -> (i32, i32, i32, i32) {
    %c0_i32 = arith.constant 0 : i32
    %c0_i32_0 = arith.constant 0 : i32
    %c0_i32_1 = arith.constant 0 : i32
    %c0_i32_2 = arith.constant 0 : i32
    %c0_i32_3 = arith.constant 0 : i32
    return %c0_i32, %c0_i32_0, %c0_i32_1, %c0_i32_2 : i32, i32, i32, i32
  }
  func.func @transform_5(%arg0: i32) -> (i32, i32, i32, i32) {
    %c0_i32 = arith.constant 0 : i32
    %c0_i32_0 = arith.constant 0 : i32
    %c0_i32_1 = arith.constant 0 : i32
    %c0_i32_2 = arith.constant 0 : i32
    %c0_i32_3 = arith.constant 0 : i32
    return %c0_i32, %c0_i32_0, %c0_i32_1, %c0_i32_2 : i32, i32, i32, i32
  }
  func.func @transform_6(%arg0: i32) -> (i32, i32, i32) {
    %c0_i32 = arith.constant 0 : i32
    %c0_i32_0 = arith.constant 0 : i32
    %c0_i32_1 = arith.constant 0 : i32
    %c0_i32_2 = arith.constant 0 : i32
    return %c0_i32, %c0_i32_0, %c0_i32_1 : i32, i32, i32
  }
  func.func @transform_7(%arg0: i32) -> (i32, i32, i32) {
    %c0_i32 = arith.constant 0 : i32
    %c0_i32_0 = arith.constant 0 : i32
    %c0_i32_1 = arith.constant 0 : i32
    %c0_i32_2 = arith.constant 0 : i32
    return %c0_i32, %c0_i32_0, %c0_i32_1 : i32, i32, i32
  }
  func.func @transform_8(%arg0: i32) -> (i32, i32) {
    %c0_i32 = arith.constant 0 : i32
    %c0_i32_0 = arith.constant 0 : i32
    %c0_i32_1 = arith.constant 0 : i32
    return %c0_i32, %c0_i32_0 : i32, i32
  }
  func.func @transform_9(%arg0: i32) -> (i32, i32) {
    %c0_i32 = arith.constant 0 : i32
    %c0_i32_0 = arith.constant 0 : i32
    %c0_i32_1 = arith.constant 0 : i32
    return %c0_i32, %c0_i32_0 : i32, i32
  }
  func.func @transform_10(%arg0: i32) -> (i32, i32, i32) {
    %c0_i32 = arith.constant 0 : i32
    %c0_i32_0 = arith.constant 0 : i32
    %c0_i32_1 = arith.constant 0 : i32
    return %arg0, %c0_i32, %c0_i32_0 : i32, i32, i32
  }
}

</mosaic_0001>

<bundles_post_ra>
// kernel: tpu_custom_call.1
= control target key start
LH: loop header
LB: loop body
LE: loop exit
PB: predicated region body
PF: predicated region fallthrough
CT: control target
= control target key end

     0   :  { %s3437_s13 = smov 0   ;;  %s3982_s0 = inlined_call_operand.vmem [shape: f32[2,8,32], index: 0, kind: input, shape index: {}]   ;;  %s3983_s1 = inlined_call_operand.vmem [shape: f32[2,1,8], index: 1, kind: input, shape index: {}]   ;;  %s3984_s2 = inlined_call_operand.vmem [shape: f32[18,128], index: 2, kind: input, shape index: {}]   ;;  %s3985_s3 = inlined_call_operand.vmem [shape: bf16[2,4,32,24], index: 3, kind: input, shape index: {}]   ;;  %s3986_s4 = inlined_call_operand.vmem [shape: f32[2,4,1,24], index: 4, kind: input, shape index: {}]   ;;  %s3987_s5 = inlined_call_operand.vmem [shape: bf16[2,4,8,32], index: 5, kind: input, shape index: {}]   ;;  %s3988_s6 = inlined_call_operand.vmem [shape: bf16[2,32,64], index: 6, kind: input, shape index: {}]   ;;  %s3989_s7 = inlined_call_operand.vmem [shape: bf16[2,64,32], index: 7, kind: input, shape index: {}]   ;;  %s3990_s8 = inlined_call_operand.vmem [shape: bf16[32,32], index: 8, kind: input, shape index: {}]   ;;  %s3991_s9 = inlined_call_operand.vmem [shape: bf16[32,1], index: 9, kind: input, shape index: {}]   ;;  %s3992_s10 = inlined_call_operand.vmem [shape: f32[2,1,1], index: 10, kind: output, shape index: {}]  }
   0x1 LB: > { %s2798_s14 = sadd.s32 4294967295, %s3376_s13   ;;  %p2802_p0 = scmp.ge.s32.totalorder %s3376_s13, 1  ;;  %s3376_s13 = sphi %s3437_s13, %s20_s13  }
   0x2   : > { %p319_p1 = scmp.lt.s32.totalorder %s3376_s13, 3 }
   0x4   : > { %p320_p2 = pnand %p2802_p0, %p319_p1 }
   0x5   : > { %p357_p3 = scmp.lt.s32.totalorder (!%p320_p2), %s2798_s14, 1  ;;  %s3380_s23 = smov (!%p320_p2), 120  }
   0x6   : > { %323 = sbr.rel (%p320_p2) target bundleno = 5334 (0x14d6), region = 60  ;;  %s3381_s11 = smov (!%p320_p2), 112  }
   0xb   : > { %s3994_s14 = smov (!%p357_p3, %s2798_s14), 1  ;;  %vm375_vm0 = vcmask 261120   ;;  %v3290_v7 = vld [vmem:[%s3985_s3 + $0x8] sm:$0xff]   ;;  %v3291_v8 = vld [vmem:[%s3985_s3 + $0x18] sm:$0xff]   ;;  %v3378_v9 = vmov 0.0   ;;  %v3292_v10 = vld [vmem:[%s3985_s3] sm:$0xff]   ;;  %v390_v15 = vlaneseq }
   0xc   : > { %s2803_s15 = sshll.u32 %s3994_s14, 3  ;;  %3014 = vmatprep.subr.bf16.mxu0 %v3378_v9  ;;  %3022 = vmatprep.subr.bf16.mxu1 %v3378_v9  ;;  %v3293_v11 = vld [vmem:[%s3985_s3 + $0x10] sm:$0xff]   ;;  %vm3379_vm1 = vmmov 0   ;;  %v3483_v18 = vld [vmem:[%s3984_s2] sm:$0xff]  ;;  %v3294_v26 = vld [vmem:[%s3985_s3 + $0x28] sm:$0xff]   ;;  %vm669_vm2 = vcmask 64512   ;;  %s363_s30 = scalar_lea.vmem %s3983_s1, %s3994_s14 }
   0xd   : > { %s360_s18 = scalar_lea.vmem %s3982_s0, %s2803_s15  ;;  %3015 = vmatpush3.bf16.msra.mxu0 %v3290_v7  ;;  %3023 = vmatpush3.bf16.msra.mxu1 %v3291_v8  ;;  %v3475_v16 = vshrl.u32 %v390_v15, 7  ;;  %v3295_v27 = vld [vmem:[%s3985_s3 + $0x38] sm:$0xff]   ;;  %v3296_v29 = vld [vmem:[%s3985_s3 + $0x20] sm:$0xff]   ;;  %v3297_v30 = vld [vmem:[%s3985_s3 + $0x30] sm:$0xff]   ;;  %vm916_vm3 = vcmask 1043456   ;;  %vm1442_vm4 = vcmask 523264   ;;  %s366_s25 = scalar_lea.vmem %s3992_s10, %s3994_s14 }
   0xe   : > { %v374_v0 = vld [vmem:[%s360_s18] sm:$0xff]  ;;  %3016 = vmatprep.subr.bf16.mxu0 %v3378_v9  ;;  %3024 = vmatprep.subr.bf16.mxu1 %v3378_v9  ;;  %vm2740_vm5 = vcmask 0  }
   0xf   : > { %v376_v1 = vsel %vm375_vm0, %v374_v0, 0.0  ;;  %3018 = vmatprep.mubr.msk.bf16.mxu0 %vm3379_vm1, %v3378_v9  ;;  %3026 = vmatprep.mubr.msk.bf16.mxu1 %vm3379_vm1, %v3378_v9  ;;  %v3478_v17 = vsub.s32 0, %v3475_v16  ;;  %v397_v19 = vsub.s32 1, %v3475_v16  ;;  %v2804_v31 = vld [vmem:[%s3986_s4] ss:$0 sm:$0xff] }
  0x10   : > { %377 = vadd.xlane.f32.xlu0 %v376_v1  ;;  %v2805_v33 = vld [vmem:[%s3986_s4 + $0x1] ss:$0 sm:$0xff]  ;;  %v2806_v44 = vld [vmem:[%s3986_s4 + $0x2] ss:$0 sm:$0xff]  ;;  %v2807_v45 = vld [vmem:[%s3986_s4 + $0x3] ss:$0 sm:$0xff] }
  0x11   : > { %3017 = vmatpush3.bf16.msra.mxu0 %v3292_v10  ;;  %3025 = vmatpush3.bf16.msra.mxu1 %v3293_v11  ;;  %v393_v20 = vrot.slane %v3483_v18, %v3478_v17  ;;  %v398_v23 = vrot.slane %v3483_v18, %v397_v19 }
  0x12   : > { %3030 = vmatprep.subr.bf16.mxu0 %v3378_v9  ;;  %3038 = vmatprep.subr.bf16.mxu1 %v3378_v9 }
  0x99   : > { %v378_v2 = vpop.xlane.xlu0 %377 }
  0x9a   : > { %v380_v3 = vmul.f32 0.03125, %v378_v2 }
  0x9c   : > { %v381_v4 = vsub.f32 %v374_v0, %v380_v3  ;;  %v371_v3 = vld [vmem:[%s363_s30] sm:$0x1] }
  0x9e   : > { %v382_v5 = vmul.f32 %v381_v4, %v381_v4 }
  0xa0   : > { %v383_v6 = vsel %vm375_vm0, %v382_v5, 0.0 }
  0xa1   : > { %384 = vadd.xlane.f32.xlu0 %v383_v6 }
 0x12a   : > { %v385_v12 = vpop.xlane.xlu0 %384 }
 0x12b   : > { %v386_v13 = vmul.f32 0.03125, %v385_v12 }
 0x12d   : > { %v387_v14 = vadd.f32 1e-05, %v386_v13 }
 0x12f   : > { %3322 = vrsqrt.f32 %v387_v14 }
 0x13c   : > { %v3323_v21 = vpop.eup %3322 }
 0x13d   : > { %v389_v22 = vmul.f32 %v3323_v21, %v381_v4  ;;  %v372_v4 = vsub.f32 1.0, %v371_v3 }
 0x13f   : > { %v394_v24 = vmul.f32 %v393_v20, %v389_v22  ;;  %v373_v5 = vmul.f32 -1e+30, %v372_v4 }
 0x141   : > { %v3491_v25 = vadd.f32 %v398_v23, %v394_v24  ;;  %v3580_v6 = vrot.slane %v373_v5, %v3478_v17 }
 0x143   : > { %v400_v28 = vpack.c.bf16 %v3491_v25, %v3491_v25 }
 0x145   : > { %3019 = vmatmul.mubr.msk.bf16.vlgmr.msra.gmra.mxu0 %vm375_vm0, %v400_v28  ;;  %3027 = vmatmul.mubr.msk.bf16.vlgmr.msra.gmra.mxu1 %vm375_vm0, %v400_v28 }
 0x146   : > { %3031 = vmatpush3.bf16.msra.mxu0 %v3294_v26  ;;  %3039 = vmatpush3.bf16.msra.mxu1 %v3295_v27 }
 0x147   : > { %3032 = vmatprep.subr.bf16.mxu0 %v3378_v9  ;;  %3040 = vmatprep.subr.bf16.mxu1 %v3378_v9 }
 0x148   : > { %3034 = vmatprep.mubr.msk.bf16.mxu0 %vm3379_vm1, %v3378_v9  ;;  %3042 = vmatprep.mubr.msk.bf16.mxu1 %vm3379_vm1, %v3378_v9 }
 0x14a   : > { %3033 = vmatpush3.bf16.msra.mxu0 %v3296_v29  ;;  %3041 = vmatpush3.bf16.msra.mxu1 %v3297_v30 }
 0x14b   : > { %3046 = vmatprep.subr.bf16.mxu0 %v3378_v9  ;;  %3052 = vmatprep.subr.bf16.mxu1 %v3378_v9 }
 0x14d   : > { %3035 = vmatmul.mubr.msk.bf16.vlgmr.msra.gmra.mxu0 %vm375_vm0, %v400_v28  ;;  %3043 = vmatmul.mubr.msk.bf16.vlgmr.msra.gmra.mxu1 %vm375_vm0, %v400_v28 }
 0x14e   : > { %3048 = vmatprep.mubr.msk.bf16.mxu0 %vm3379_vm1, %v3378_v9  ;;  %3054 = vmatprep.mubr.msk.bf16.mxu1 %vm3379_vm1, %v3378_v9 }
 0x205   : > { %v494_v32 = vpop.f32.mrf.mxu0  ;;  %v546_v34 = vpop.f32.mrf.mxu1 }
 0x206   : > { %v495_v35 = vadd.f32 %v2804_v31, %v494_v32  ;;  %v547_v39 = vadd.f32 %v2805_v33, %v546_v34 }
 0x207   : > { %v3020_v36 = vpop.f32.mrf.mxu0  ;;  %v3028_v37 = vpop.f32.mrf.mxu1 }
 0x208   : > { %v3529_v38 = vpack.c.bf16 %v495_v35, %v495_v35  ;;  %v3539_v46 = vpack.c.bf16 %v547_v39, %v547_v39 }
 0x209   : > { %v497_v40 = vpop.f32.mrf.mxu0  ;;  %v549_v41 = vpop.f32.mrf.mxu1 }
 0x20a   : > { %667 = vrot.lane.b32.xlu1 %v3529_v38, %s3380_s23 }
 0x20b   : > { %v3021_v42 = vpop.f32.mrf.mxu0  ;;  %v3029_v43 = vpop.f32.mrf.mxu1 }
 0x20d   : > { %v598_v47 = vpop.f32.mrf.mxu0  ;;  %v650_v48 = vpop.f32.mrf.mxu1 }
 0x20e   : > { %v599_v49 = vadd.f32 %v2806_v44, %v598_v47  ;;  %v651_v50 = vadd.f32 %v2807_v45, %v650_v48  ;;  %717 = vrot.lane.b32.xlu1 %v3539_v46, %s3380_s23 }
 0x20f   : > { %v3036_v51 = vpop.f32.mrf.mxu0  ;;  %v3044_v52 = vpop.f32.mrf.mxu1 }
 0x210   : > { %v3543_v53 = vpack.c.bf16 %v599_v49, %v599_v49  ;;  %v3545_v54 = vpack.c.bf16 %v651_v50, %v651_v50 }
 0x211   : > { %v601_v55 = vpop.f32.mrf.mxu0  ;;  %v653_v56 = vpop.f32.mrf.mxu1 }
 0x212   : > { %815 = vrot.lane.b32.xlu1 %v3545_v54, %s3380_s23  ;;  %766 = vrot.lane.b32.xlu0 %v3543_v53, %s3380_s23 }
 0x213   : > { %v3037_v57 = vpop.f32.mrf.mxu0  ;;  %v3045_v58 = vpop.f32.mrf.mxu1 }
 0x27c   : > { %v668_v59 = vpop.permute.xlu1 %667 }
 0x27d   : > { %v674_v60 = vsel %vm669_vm2, %v668_v59, 0 }
 0x27e   : > { %3047 = vmatpush3.bf16.xpose.msra.mxu0 %v674_v60 }
 0x27f   : > { %3058 = vmatprep.subr.bf16.mxu0 %v3378_v9 }
 0x280   : > { %v718_v61 = vpop.permute.xlu1 %717 }
 0x281   : > { %v723_v62 = vsel %vm669_vm2, %v718_v61, 0 }
 0x282   : > { %3053 = vmatpush3.bf16.xpose.msra.mxu1 %v723_v62 }
 0x283   : > { %3064 = vmatprep.subr.bf16.mxu1 %v3378_v9 }
 0x284   : > { %v767_v63 = vpop.permute.xlu0 %766  ;;  %v816_v1 = vpop.permute.xlu1 %815 }
 0x285   : > { %v772_v0 = vsel %vm669_vm2, %v767_v63, 0  ;;  %3049 = vmatmul.mubr.msk.bf16.vlgmr.msra.gmra.mxu0 %vm669_vm2, %v3529_v38  ;;  %v821_v2 = vsel %vm669_vm2, %v816_v1, 0 }
 0x286   : > { %3059 = vmatpush3.bf16.xpose.msra.mxu0 %v772_v0  ;;  %3060 = vmatprep.mubr.msk.bf16.mxu0 %vm3379_vm1, %v3378_v9 }
 0x287   : > { %3070 = vmatprep.subr.bf16.mxu0 %v3378_v9 }
 0x289   : > { %3055 = vmatmul.mubr.msk.bf16.vlgmr.msra.gmra.mxu1 %vm669_vm2, %v3539_v46 }
 0x28a   : > { %3065 = vmatpush3.bf16.xpose.msra.mxu1 %v821_v2  ;;  %3066 = vmatprep.mubr.msk.bf16.mxu1 %vm3379_vm1, %v3378_v9 }
 0x28b   : > { %3076 = vmatprep.subr.bf16.mxu1 %v3378_v9 }
 0x28d   : > { %3061 = vmatmul.mubr.msk.bf16.vlgmr.msra.gmra.mxu0 %vm669_vm2, %v3543_v53 }
 0x28e   : > { %3072 = vmatprep.mubr.msk.bf16.mxu0 %vm3379_vm1, %v3378_v9 }
 0x291   : > { %3067 = vmatmul.mubr.msk.bf16.vlgmr.msra.gmra.mxu1 %vm669_vm2, %v3545_v54 }
 0x292   : > { %3078 = vmatprep.mubr.msk.bf16.mxu1 %vm3379_vm1, %v3378_v9 }
 0x345   : > { %v710_v7 = vpop.f32.mrf.mxu0 }
 0x346   : > { %v711_v8 = vadd.f32 %v710_v7, %v3580_v6 }
 0x347   : > { %v3050_v10 = vpop.f32.mrf.mxu0 }
 0x348   : > { %v863_v11 = vsel %vm669_vm2, %v711_v8, -inf }
 0x349   : > { %v759_v12 = vpop.f32.mrf.mxu1  ;;  %864 = vmax.xlane.f32.xlu1 %v863_v11  ;;  %v713_v13 = vpop.f32.mrf.mxu0 }
 0x34a   : > { %v760_v14 = vadd.f32 %v759_v12, %v3580_v6  ;;  %v1108_v13 = vld [vmem:[%s3987_s5] sm:$0xf] }
 0x34b   : > { %v3051_v15 = vpop.f32.mrf.mxu0  ;;  %v3056_v20 = vpop.f32.mrf.mxu1 }
 0x34c   : > { %v866_v21 = vsel %vm669_vm2, %v760_v14, -inf }
 0x34d   : > { %v762_v22 = vpop.f32.mrf.mxu1  ;;  %867 = vmax.xlane.f32.xlu0 %v866_v21  ;;  %v808_v23 = vpop.f32.mrf.mxu0  ;;  %v1116_v21 = vsel %vm916_vm3, %v1108_v13, 0 }
 0x34e   : > { %v809_v24 = vadd.f32 %v808_v23, %v3580_v6 }
 0x34f   : > { %v3057_v26 = vpop.f32.mrf.mxu1  ;;  %v3062_v27 = vpop.f32.mrf.mxu0 }
 0x350   : > { %v869_v28 = vsel %vm669_vm2, %v809_v24, -inf  ;;  %v1109_v26 = vld [vmem:[%s3987_s5 + $0x4] sm:$0xf] }
 0x351   : > { %v857_v29 = vpop.f32.mrf.mxu1  ;;  %870 = vmax.xlane.f32.xlu1 %v869_v28  ;;  %v811_v30 = vpop.f32.mrf.mxu0  ;;  %v1162_v27 = vsel %vm916_vm3, %v1109_v26, 0  ;;  %v1110_v28 = vld [vmem:[%s3987_s5 + $0x8] sm:$0xf] }
 0x352   : > { %v858_v31 = vadd.f32 %v857_v29, %v3580_v6 }
 0x353   : > { %v3063_v32 = vpop.f32.mrf.mxu0  ;;  %v3068_v33 = vpop.f32.mrf.mxu1 }
 0x354   : > { %v872_v34 = vsel %vm669_vm2, %v858_v31, -inf  ;;  %v1111_v33 = vld [vmem:[%s3987_s5 + $0xc] sm:$0xf] }
 0x355   : > { %v860_v35 = vpop.f32.mrf.mxu1  ;;  %873 = vmax.xlane.f32.xlu1 %v872_v34 }
 0x357   : > { %v3069_v36 = vpop.f32.mrf.mxu1 }
 0x363   : > { %911 = vrot.lane.b32.xlu0 %v3529_v38, %s3381_s11 }
 0x366   : > { %960 = vrot.lane.b32.xlu1 %v3539_v46, %s3381_s11 }
 0x3d2   : > { %v865_v37 = vpop.xlane.xlu1 %864 }
 0x3d3   : > { %v875_v39 = vsub.f32 %v711_v8, %v865_v37  ;;  %v1254_v37 = vsel %vm916_vm3, %v1111_v33, 0  ;;  %v1329_v33 = vsub.s32 4, %v3475_v16 }
 0x3d5   : > { %v879_v40 = vmul.f32 1.442695, %v875_v39 }
 0x3d6   : > { %v868_v41 = vpop.xlane.xlu0 %867 }
 0x3d7   : > { %3324 = vpow2.f32 %v879_v40  ;;  %v876_v42 = vsub.f32 %v760_v14, %v868_v41 }
 0x3d9   : > { %v881_v43 = vmul.f32 1.442695, %v876_v42 }
 0x3da   : > { %v912_v44 = vpop.permute.xlu0 %911  ;;  %v871_v45 = vpop.xlane.xlu1 %870 }
 0x3db   : > { %3326 = vpow2.f32 %v881_v43  ;;  %v918_v47 = vsel %vm916_vm3, %v912_v44, 0  ;;  %v877_v48 = vsub.f32 %v809_v24, %v871_v45 }
 0x3dc   : > { %3071 = vmatpush3.bf16.msra.mxu0 %v918_v47 }
 0x3dd   : > { %v883_v49 = vmul.f32 1.442695, %v877_v48  ;;  %3082 = vmatprep.subr.bf16.mxu0 %v3378_v9 }
 0x3de   : > { %v874_v38 = vpop.xlane.xlu1 %873 }
 0x3df   : > { %3328 = vpow2.f32 %v883_v49  ;;  %v878_v46 = vsub.f32 %v858_v31, %v874_v38  ;;  %v1208_v31 = vsel %vm916_vm3, %v1110_v28, 0  ;;  %v3298_v28 = vld [vmem:[%s3988_s6 + $0x8] sm:$0xff]  }
 0x3e1   : > { %v885_v50 = vmul.f32 1.442695, %v878_v46 }
 0x3e2   : > { %v961_v51 = vpop.permute.xlu1 %960 }
 0x3e3   : > { %3330 = vpow2.f32 %v885_v50  ;;  %v966_v52 = vsel %vm916_vm3, %v961_v51, 0 }
 0x3e4   : > { %v3325_v55 = vpop.eup %3324  ;;  %3077 = vmatpush3.bf16.msra.mxu1 %v966_v52 }
 0x3e5   : > { %v887_v56 = vsel %vm669_vm2, %v3325_v55, 0.0  ;;  %3088 = vmatprep.subr.bf16.mxu1 %v3378_v9 }
 0x3e6   : > { %888 = vadd.xlane.f32.xlu1 %v887_v56 }
 0x3e8   : > { %v3327_v57 = vpop.eup %3326 }
 0x3e9   : > { %v890_v58 = vsel %vm669_vm2, %v3327_v57, 0.0 }
 0x3ea   : > { %891 = vadd.xlane.f32.xlu1 %v890_v58 }
 0x3ec   : > { %v3329_v59 = vpop.eup %3328 }
 0x3ed   : > { %v893_v60 = vsel %vm669_vm2, %v3329_v59, 0.0 }
 0x3ee   : > { %894 = vadd.xlane.f32.xlu0 %v893_v60 }
 0x3f0   : > { %v3331_v61 = vpop.eup %3330 }
 0x3f1   : > { %v896_v62 = vsel %vm669_vm2, %v3331_v61, 0.0 }
 0x3f2   : > { %897 = vadd.xlane.f32.xlu1 %v896_v62 }
 0x403   : > { %1008 = vrot.lane.b32.xlu1 %v3543_v53, %s3381_s11 }
 0x404   : > { %1056 = vrot.lane.b32.xlu0 %v3545_v54, %s3381_s11 }
 0x46f   : > { %v889_v63 = vpop.xlane.xlu1 %888 }
 0x470   : > { %3332 = vrcp.f32 %v889_v63  ;;  %v1305_v63 = vsub.s32 2, %v3475_v16 }
 0x473   : > { %v892_v0 = vpop.xlane.xlu1 %891 }
 0x474   : > { %3334 = vrcp.f32 %v892_v0 }
 0x477   : > { %v895_v1 = vpop.xlane.xlu0 %894 }
 0x478   : > { %3336 = vrcp.f32 %v895_v1 }
 0x47b   : > { %v898_v2 = vpop.xlane.xlu1 %897  ;;  %v1057_v11 = vpop.permute.xlu0 %1056 }
 0x47c   : > { %3338 = vrcp.f32 %v898_v2  ;;  %v1062_v14 = vsel %vm916_vm3, %v1057_v11, 0 }
 0x47d   : > { %v3333_v3 = vpop.eup %3332 }
 0x47e   : > { %v900_v4 = vmul.f32 %v3333_v3, %v3325_v55 }
 0x47f   : > { %v1009_v5 = vpop.permute.xlu1 %1008 }
 0x480   : > { %v1014_v7 = vsel %vm916_vm3, %v1009_v5, 0  ;;  %v907_v8 = vpack.c.bf16 %v900_v4, %v900_v4 }
 0x481   : > { %v3335_v10 = vpop.eup %3334 }
 0x482   : > { %3073 = vmatmul.mubr.msk.bf16.vlgmr.msra.gmra.mxu0 %vm669_vm2, %v907_v8  ;;  %v902_v53 = vmul.f32 %v3335_v10, %v3327_v57  ;;  %v1306_v10 = vrot.slane %v3483_v18, %v1305_v63 }
 0x483   : > { %3083 = vmatpush3.bf16.msra.mxu0 %v1014_v7  ;;  %3084 = vmatprep.mubr.msk.bf16.mxu0 %vm3379_vm1, %v3378_v9 }
 0x484   : > { %v908_v54 = vpack.c.bf16 %v902_v53, %v902_v53  ;;  %3094 = vmatprep.subr.bf16.mxu0 %v3378_v9 }
 0x485   : > { %v3337_v12 = vpop.eup %3336 }
 0x486   : > { %3079 = vmatmul.mubr.msk.bf16.vlgmr.msra.gmra.mxu1 %vm669_vm2, %v908_v54  ;;  %v904_v15 = vmul.f32 %v3337_v12, %v3329_v59 }
 0x487   : > { %3089 = vmatpush3.bf16.msra.mxu1 %v1062_v14  ;;  %3090 = vmatprep.mubr.msk.bf16.mxu1 %vm3379_vm1, %v3378_v9 }
 0x488   : > { %v909_v20 = vpack.c.bf16 %v904_v15, %v904_v15  ;;  %3100 = vmatprep.subr.bf16.mxu1 %v3378_v9 }
 0x489   : > { %v3339_v22 = vpop.eup %3338 }
 0x48a   : > { %3085 = vmatmul.mubr.msk.bf16.vlgmr.msra.gmra.mxu0 %vm669_vm2, %v909_v20  ;;  %v906_v23 = vmul.f32 %v3339_v22, %v3331_v61 }
 0x48b   : > { %3095 = vmatpush3.bf16.msra.mxu0 %v1116_v21  ;;  %3096 = vmatprep.mubr.msk.bf16.mxu0 %vm3379_vm1, %v3378_v9 }
 0x48c   : > { %v910_v24 = vpack.c.bf16 %v906_v23, %v906_v23  ;;  %3106 = vmatprep.subr.bf16.mxu0 %v3378_v9 }
 0x48e   : > { %3091 = vmatmul.mubr.msk.bf16.vlgmr.msra.gmra.mxu1 %vm669_vm2, %v910_v24 }
 0x48f   : > { %3102 = vmatprep.mubr.msk.bf16.mxu1 %vm3379_vm1, %v3378_v9  ;;  %3101 = vmatpush3.bf16.msra.mxu1 %v1162_v27 }
 0x490   : > { %3112 = vmatprep.subr.bf16.mxu1 %v3378_v9 }
 0x542   : > { %v954_v29 = vpop.f32.mrf.mxu0 }
 0x543   : > { %v1104_v30 = vpack.c.bf16 %v954_v29, %v954_v29  ;;  %v3299_v29 = vld [vmem:[%s3988_s6] sm:$0xff]  }
 0x544   : > { %v3074_v32 = vpop.f32.mrf.mxu0 }
 0x545   : > { %3097 = vmatmul.mubr.msk.bf16.vlgmr.msra.gmra.mxu0 %vm669_vm2, %v1104_v30  ;;  %v1324_v32 = vsub.s32 3, %v3475_v16 }
 0x546   : > { %v957_v34 = vpop.f32.mrf.mxu0  ;;  %v1002_v35 = vpop.f32.mrf.mxu1  ;;  %3107 = vmatpush3.bf16.msra.mxu0 %v1208_v31  ;;  %3108 = vmatprep.mubr.msk.bf16.mxu0 %vm3379_vm1, %v3378_v9 }
 0x547   : > { %v1105_v36 = vpack.c.bf16 %v1002_v35, %v1002_v35  ;;  %3118 = vmatprep.subr.bf16.mxu0 %v3378_v9  ;;  %v1325_v34 = vrot.slane %v3483_v18, %v1324_v32 }
 0x548   : > { %v3075_v39 = vpop.f32.mrf.mxu0  ;;  %v3080_v40 = vpop.f32.mrf.mxu1 }
 0x549   : > { %3103 = vmatmul.mubr.msk.bf16.vlgmr.msra.gmra.mxu1 %vm669_vm2, %v1105_v36 }
 0x54a   : > { %v1005_v41 = vpop.f32.mrf.mxu1  ;;  %v1050_v42 = vpop.f32.mrf.mxu0  ;;  %3113 = vmatpush3.bf16.msra.mxu1 %v1254_v37  ;;  %3114 = vmatprep.mubr.msk.bf16.mxu1 %vm3379_vm1, %v3378_v9  ;;  %v1330_v37 = vrot.slane %v3483_v18, %v1329_v33 }
 0x54b   : > { %v1106_v43 = vpack.c.bf16 %v1050_v42, %v1050_v42  ;;  %3126 = vmatprep.subr.bf16.mxu1 %v3378_v9  ;;  %v3300_v42 = vld [vmem:[%s3989_s7 + $0x18] sm:$0xff]  }
 0x54c   : > { %v3081_v44 = vpop.f32.mrf.mxu1  ;;  %v3086_v45 = vpop.f32.mrf.mxu0 }
 0x54d   : > { %3109 = vmatmul.mubr.msk.bf16.vlgmr.msra.gmra.mxu0 %vm669_vm2, %v1106_v43  ;;  %v3301_v43 = vld [vmem:[%s3989_s7 + $0x10] sm:$0xff]   ;;  %v3302_v44 = vld [vmem:[%s3989_s7 + $0x8] sm:$0xff]   ;;  %v3303_v45 = vld [vmem:[%s3989_s7] sm:$0xff]  }
 0x54e   : > { %v1053_v47 = vpop.f32.mrf.mxu0  ;;  %v1098_v48 = vpop.f32.mrf.mxu1  ;;  %3122 = vmatprep.mubr.msk.bf16.mxu0 %vm3379_vm1, %v3378_v9  ;;  %3119 = vmatpush3.bf16.msra.mxu0 %v3298_v28  ;;  %v3733_v28 = vld [vmem:[%s3984_s2 + $0x8] sm:$0xff] }
 0x54f   : > { %v1107_v49 = vpack.c.bf16 %v1098_v48, %v1098_v48  ;;  %3120 = vmatprep.subr.bf16.mxu0 %v3378_v9  ;;  %v1339_v47 = vsub.s32 5, %v3475_v16 }
 0x550   : > { %v3087_v38 = vpop.f32.mrf.mxu0  ;;  %v3092_v46 = vpop.f32.mrf.mxu1 }
 0x551   : > { %3115 = vmatmul.mubr.msk.bf16.vlgmr.msra.gmra.mxu1 %vm669_vm2, %v1107_v49  ;;  %v1340_v48 = vrot.slane %v3483_v18, %v1339_v47 }
 0x552   : > { %v1101_v50 = vpop.f32.mrf.mxu1  ;;  %3134 = vmatprep.mubr.msk.bf16.mxu1 %vm3379_vm1, %v3378_v9  ;;  %3121 = vmatpush3.bf16.msra.mxu0 %v3299_v29 }
 0x553   : > { %3138 = vmatprep.subr.bf16.mxu0 %v3378_v9  ;;  %3127 = vmatpush3.bf16.msra.mxu1 %v3300_v42 }
 0x554   : > { %v3093_v51 = vpop.f32.mrf.mxu1  ;;  %3128 = vmatprep.subr.bf16.mxu1 %v3378_v9 }
 0x557   : > { %3129 = vmatpush3.bf16.msra.mxu1 %v3301_v43 }
 0x558   : > { %3130 = vmatprep.subr.bf16.mxu1 %v3378_v9 }
 0x55b   : > { %3131 = vmatpush3.bf16.msra.mxu1 %v3302_v44 }
 0x55c   : > { %3132 = vmatprep.subr.bf16.mxu1 %v3378_v9 }
 0x55f   : > { %3133 = vmatpush3.bf16.msra.mxu1 %v3303_v45 }
 0x560   : > { %3154 = vmatprep.subr.bf16.mxu1 %v3378_v9 }
 0x605   : > { %v1152_v52 = vpop.f32.mrf.mxu0 }
 0x606   : > { %v1296_v0 = vsel %vm375_vm0, %v1152_v52, 0.0 }
 0x607   : > { %v3098_v55 = vpop.f32.mrf.mxu0 }
 0x609   : > { %v1155_v56 = vpop.f32.mrf.mxu0  ;;  %v1198_v57 = vpop.f32.mrf.mxu1 }
 0x60a   : > { %v1297_v60 = vsel %vm375_vm0, %v1198_v57, 0.0 }
 0x60b   : > { %v3099_v58 = vpop.f32.mrf.mxu0  ;;  %v3104_v59 = vpop.f32.mrf.mxu1  ;;  %v1298_v2 = vadd.f32 %v1297_v60, %v1296_v0 }
 0x60d   : > { %v1201_v61 = vpop.f32.mrf.mxu1  ;;  %v1244_v62 = vpop.f32.mrf.mxu0 }
 0x60e   : > { %v1299_v1 = vsel %vm375_vm0, %v1244_v62, 0.0 }
 0x60f   : > { %v3105_v3 = vpop.f32.mrf.mxu1  ;;  %v3110_v4 = vpop.f32.mrf.mxu0  ;;  %v1300_v5 = vadd.f32 %v1299_v1, %v1298_v2  ;;  %v1416_v1 = vsub.s32 6, %v3475_v16 }
 0x611   : > { %v1247_v7 = vpop.f32.mrf.mxu0  ;;  %v1290_v8 = vpop.f32.mrf.mxu1  ;;  %v1417_v2 = vrot.slane %v3483_v18, %v1416_v1 }
 0x612   : > { %v1301_v53 = vsel %vm375_vm0, %v1290_v8, 0.0 }
 0x613   : > { %v1302_v11 = vadd.f32 %v1301_v53, %v1300_v5  ;;  %v3111_v54 = vpop.f32.mrf.mxu0  ;;  %v3116_v12 = vpop.f32.mrf.mxu1 }
 0x615   : > { %v1307_v13 = vadd.f32 %v1306_v10, %v1302_v11  ;;  %v1293_v14 = vpop.f32.mrf.mxu1 }
 0x617   : > { %v3117_v15 = vpop.f32.mrf.mxu1  ;;  %v1308_v20 = vadd.f32 %v1307_v13, %v3491_v25 }
 0x618   : > { %v3304_v15 = vld [vmem:[%s3985_s3 + $0x48] sm:$0xff]  }
 0x619   : > { %v1309_v21 = vsel %vm375_vm0, %v1308_v20, 0.0 }
 0x61a   : > { %1310 = vadd.xlane.f32.xlu1 %v1309_v21  ;;  %v3306_v21 = vld [vmem:[%s3985_s3 + $0x40] sm:$0xff]  }
 0x6a3   : > { %v1311_v22 = vpop.xlane.xlu1 %1310 }
 0x6a4   : > { %v1312_v23 = vmul.f32 0.03125, %v1311_v22  ;;  %v3307_v22 = vld [vmem:[%s3985_s3 + $0x60] sm:$0xff]  }
 0x6a6   : > { %v1313_v24 = vsub.f32 %v1308_v20, %v1312_v23  ;;  %v3305_v20 = vld [vmem:[%s3985_s3 + $0x68] sm:$0xff]  }
 0x6a8   : > { %v1314_v26 = vmul.f32 %v1313_v24, %v1313_v24 }
 0x6aa   : > { %v1315_v27 = vsel %vm375_vm0, %v1314_v26, 0.0 }
 0x6ab   : > { %1316 = vadd.xlane.f32.xlu0 %v1315_v27  ;;  %v1502_v27 = vsub.s32 7, %v3475_v16  ;;  %v3321_v16 = vld [vmem:[%s3991_s9] sm:$0xff]  }
 0x6ad   : > { %v1503_v29 = vrot.slane %v3483_v18, %v1502_v27  ;;  %v3309_v18 = vld [vmem:[%s3985_s3 + $0x50] sm:$0xff]  }
 0x734   : > { %v1317_v25 = vpop.xlane.xlu0 %1316 }
 0x735   : > { %v1318_v30 = vmul.f32 0.03125, %v1317_v25 }
 0x737   : > { %v1319_v31 = vadd.f32 1e-05, %v1318_v30 }
 0x739   : > { %3340 = vrsqrt.f32 %v1319_v31  ;;  %v1508_v31 = vrot.slane %v3733_v28, %v3478_v17  ;;  %v3310_v17 = vld [vmem:[%s3985_s3 + $0x78] sm:$0xff]  }
 0x746   : > { %v3341_v35 = vpop.eup %3340 }
 0x747   : > { %v1321_v36 = vmul.f32 %v3341_v35, %v1313_v24 }
 0x749   : > { %v1326_v39 = vmul.f32 %v1325_v34, %v1321_v36  ;;  %v3308_v36 = vld [vmem:[%s3985_s3 + $0x58] sm:$0xff]  }
 0x74b   : > { %v1331_v40 = vadd.f32 %v1330_v37, %v1326_v39  ;;  %v3311_v39 = vld [vmem:[%s3985_s3 + $0x70] sm:$0xff]  }
 0x74d   : > { %v1332_v41 = vpack.c.bf16 %v1331_v40, %v1331_v40 }
 0x74f   : > { %3123 = vmatmul.mubr.msk.bf16.vlgmr.msra.gmra.mxu0 %vm375_vm0, %v1332_v41 }
 0x750   : > { %3142 = vmatprep.mubr.msk.bf16.mxu0 %vm3379_vm1, %v3378_v9  ;;  %3139 = vmatpush3.bf16.msra.mxu0 %v3304_v15 }
 0x751   : > { %3140 = vmatprep.subr.bf16.mxu0 %v3378_v9 }
 0x754   : > { %3141 = vmatpush3.bf16.msra.mxu0 %v3306_v21 }
 0x755   : > { %3146 = vmatprep.subr.bf16.mxu0 %v3378_v9 }
 0x80f   : > { %v1390_v49 = vpop.f32.mrf.mxu0 }
 0x810   : > { %v1391_v38 = vadd.f32 %v1390_v49, %v1340_v48 }
 0x811   : > { %v3124_v46 = vpop.f32.mrf.mxu0 }
 0x812   : > { %v1397_v50 = vmul.f32 0.044715, %v1391_v38  ;;  %v1396_v60 = vmul.f32 0.5, %v1391_v38 }
 0x813   : > { %v1393_v51 = vpop.f32.mrf.mxu0 }
 0x814   : > { %v1398_v52 = vmul.f32 %v1397_v50, %v1391_v38  ;;  %v2861_v51 = vld [vmem:[%s3986_s4 + $0x5] ss:$0 sm:$0xff] }
 0x815   : > { %v3125_v55 = vpop.f32.mrf.mxu0 }
 0x816   : > { %v1399_v56 = vmul.f32 %v1398_v52, %v1391_v38  ;;  %v2862_v52 = vld [vmem:[%s3986_s4 + $0x6] ss:$0 sm:$0xff] }
 0x818   : > { %v1400_v57 = vadd.f32 %v1399_v56, %v1391_v38 }
 0x81a   : > { %v1401_v58 = vmul.f32 0.7978846, %v1400_v57 }
 0x81c   : > { %3342 = vtanh.f32 %v1401_v58 }
 0x829   : > { %v3343_v59 = vpop.eup %3342 }
 0x82a   : > { %v1403_v61 = vadd.f32 1.0, %v3343_v59 }
 0x82c   : > { %v1404_v62 = vmul.f32 %v1403_v61, %v1396_v60 }
 0x82e   : > { %v1405_v0 = vpack.c.bf16 %v1404_v62, %v1404_v62  ;;  %v2863_v62 = vld [vmem:[%s3986_s4 + $0x7] ss:$0 sm:$0xff] }
 0x830   : > { %3135 = vmatmul.mubr.msk.bf16.vlgmr.msra.gmra.mxu1 %vm1442_vm4, %v1405_v0 }
 0x831   : > { %3158 = vmatprep.mubr.msk.bf16.mxu1 %vm3379_vm1, %v3378_v9  ;;  %3155 = vmatpush3.bf16.msra.mxu1 %v3305_v20 }
 0x832   : > { %3156 = vmatprep.subr.bf16.mxu1 %v3378_v9 }
 0x835   : > { %3157 = vmatpush3.bf16.msra.mxu1 %v3307_v22 }
 0x836   : > { %3170 = vmatprep.subr.bf16.mxu1 %v3378_v9 }
 0x8f0   : > { %v1480_v3 = vpop.f32.mrf.mxu1 }
 0x8f1   : > { %v1481_v4 = vadd.f32 %v1480_v3, %v1417_v2 }
 0x8f2   : > { %v3136_v5 = vpop.f32.mrf.mxu1 }
 0x8f3   : > { %v1486_v7 = vadd.f32 %v1481_v4, %v1331_v40  ;;  %v2860_v40 = vld [vmem:[%s3986_s4 + $0x4] ss:$0 sm:$0xff] }
 0x8f4   : > { %v1483_v8 = vpop.f32.mrf.mxu1 }
 0x8f5   : > { %v1487_v10 = vsel %vm375_vm0, %v1486_v7, 0.0 }
 0x8f6   : > { %1488 = vadd.xlane.f32.xlu0 %v1487_v10  ;;  %v3137_v53 = vpop.f32.mrf.mxu1 }
 0x97f   : > { %v1489_v11 = vpop.xlane.xlu0 %1488 }
 0x980   : > { %v1490_v54 = vmul.f32 0.03125, %v1489_v11 }
 0x982   : > { %v1491_v12 = vsub.f32 %v1486_v7, %v1490_v54 }
 0x984   : > { %v1492_v13 = vmul.f32 %v1491_v12, %v1491_v12 }
 0x986   : > { %v1493_v14 = vsel %vm375_vm0, %v1492_v13, 0.0 }
 0x987   : > { %1494 = vadd.xlane.f32.xlu1 %v1493_v14 }
 0xa10   : > { %v1495_v23 = vpop.xlane.xlu1 %1494 }
 0xa11   : > { %v1496_v24 = vmul.f32 0.03125, %v1495_v23 }
 0xa13   : > { %v1497_v26 = vadd.f32 1e-05, %v1496_v24 }
 0xa15   : > { %3344 = vrsqrt.f32 %v1497_v26 }
 0xa22   : > { %v3345_v25 = vpop.eup %3344 }
 0xa23   : > { %v1499_v30 = vmul.f32 %v3345_v25, %v1491_v12 }
 0xa25   : > { %v1504_v34 = vmul.f32 %v1503_v29, %v1499_v30 }
 0xa27   : > { %v3740_v35 = vadd.f32 %v1508_v31, %v1504_v34 }
 0xa29   : > { %v1510_v37 = vpack.c.bf16 %v3740_v35, %v3740_v35 }
 0xa2b   : > { %3143 = vmatmul.mubr.msk.bf16.vlgmr.msra.gmra.mxu0 %vm375_vm0, %v1510_v37  ;;  %3159 = vmatmul.mubr.msk.bf16.vlgmr.msra.gmra.mxu1 %vm375_vm0, %v1510_v37 }
 0xa2c   : > { %3147 = vmatpush3.bf16.msra.mxu0 %v3308_v36  ;;  %3150 = vmatprep.mubr.msk.bf16.mxu0 %vm3379_vm1, %v3378_v9 }
 0xa2d   : > { %3148 = vmatprep.subr.bf16.mxu0 %v3378_v9  ;;  %3172 = vmatprep.mubr.msk.bf16.mxu1 %vm3379_vm1, %v3378_v9 }
 0xa30   : > { %3149 = vmatpush3.bf16.msra.mxu0 %v3309_v18 }
 0xa31   : > { %3162 = vmatprep.subr.bf16.mxu0 %v3378_v9 }
 0xa33   : > { %3151 = vmatmul.mubr.msk.bf16.vlgmr.msra.gmra.mxu0 %vm375_vm0, %v1510_v37 }
 0xa34   : > { %3163 = vmatpush3.bf16.msra.mxu0 %v3310_v17  ;;  %3166 = vmatprep.mubr.msk.bf16.mxu0 %vm3379_vm1, %v3378_v9 }
 0xa35   : > { %3164 = vmatprep.subr.bf16.mxu0 %v3378_v9 }
 0xa38   : > { %3165 = vmatpush3.bf16.msra.mxu0 %v3311_v39 }
 0xa39   : > { %3176 = vmatprep.subr.bf16.mxu0 %v3378_v9 }
 0xa3b   : > { %3167 = vmatmul.mubr.msk.bf16.vlgmr.msra.gmra.mxu0 %vm375_vm0, %v1510_v37 }
 0xa3c   : > { %3178 = vmatprep.mubr.msk.bf16.mxu0 %vm3379_vm1, %v3378_v9 }
 0xaeb   : > { %v1606_v41 = vpop.f32.mrf.mxu0  ;;  %v1710_v42 = vpop.f32.mrf.mxu1 }
 0xaec   : > { %v1607_v43 = vadd.f32 %v2860_v40, %v1606_v41  ;;  %v1711_v58 = vadd.f32 %v2862_v52, %v1710_v42 }
 0xaed   : > { %v3144_v44 = vpop.f32.mrf.mxu0  ;;  %v3160_v45 = vpop.f32.mrf.mxu1 }
 0xaee   : > { %v3775_v48 = vpack.c.bf16 %v1607_v43, %v1607_v43  ;;  %v3792_v0 = vpack.c.bf16 %v1711_v58, %v1711_v58 }
 0xaef   : > { %v1609_v49 = vpop.f32.mrf.mxu0  ;;  %v1713_v38 = vpop.f32.mrf.mxu1 }
 0xaf0   : > { %1773 = vrot.lane.b32.xlu0 %v3775_v48, %s3380_s23 }
 0xaf1   : > { %v3145_v46 = vpop.f32.mrf.mxu0  ;;  %v3161_v50 = vpop.f32.mrf.mxu1 }
 0xaf3   : > { %v1658_v55 = vpop.f32.mrf.mxu0 }
 0xaf4   : > { %v1659_v56 = vadd.f32 %v2861_v51, %v1658_v55 }
 0xaf5   : > { %v3152_v57 = vpop.f32.mrf.mxu0 }
 0xaf6   : > { %v3785_v59 = vpack.c.bf16 %v1659_v56, %v1659_v56 }
 0xaf7   : > { %v1661_v60 = vpop.f32.mrf.mxu0 }
 0xaf8   : > { %1822 = vrot.lane.b32.xlu1 %v3785_v59, %s3380_s23 }
 0xaf9   : > { %v3153_v61 = vpop.f32.mrf.mxu0 }
 0xafb   : > { %v1762_v2 = vpop.f32.mrf.mxu0 }
 0xafc   : > { %v1763_v3 = vadd.f32 %v2863_v62, %v1762_v2  ;;  %1871 = vrot.lane.b32.xlu1 %v3792_v0, %s3380_s23 }
 0xafd   : > { %v3168_v4 = vpop.f32.mrf.mxu0 }
 0xafe   : > { %v3796_v5 = vpack.c.bf16 %v1763_v3, %v1763_v3 }
 0xaff   : > { %v1765_v7 = vpop.f32.mrf.mxu0 }
 0xb00   : > { %1920 = vrot.lane.b32.xlu0 %v3796_v5, %s3380_s23 }
 0xb01   : > { %v3169_v8 = vpop.f32.mrf.mxu0 }
 0xb62   : > { %v1774_v10 = vpop.permute.xlu0 %1773 }
 0xb63   : > { %v1779_v53 = vsel %vm669_vm2, %v1774_v10, 0 }
 0xb64   : > { %3171 = vmatpush3.bf16.xpose.msra.mxu1 %v1779_v53 }
 0xb65   : > { %3182 = vmatprep.subr.bf16.mxu1 %v3378_v9 }
 0xb6a   : > { %v1823_v11 = vpop.permute.xlu1 %1822 }
 0xb6b   : > { %v1828_v54 = vsel %vm669_vm2, %v1823_v11, 0  ;;  %3173 = vmatmul.mubr.msk.bf16.vlgmr.msra.gmra.mxu1 %vm669_vm2, %v3775_v48 }
 0xb6c   : > { %3177 = vmatpush3.bf16.xpose.msra.mxu0 %v1828_v54  ;;  %3184 = vmatprep.mubr.msk.bf16.mxu1 %vm3379_vm1, %v3378_v9 }
 0xb6d   : > { %3188 = vmatprep.subr.bf16.mxu0 %v3378_v9 }
 0xb6e   : > { %v1872_v12 = vpop.permute.xlu1 %1871 }
 0xb6f   : > { %v1877_v13 = vsel %vm669_vm2, %v1872_v12, 0 }
 0xb70   : > { %3183 = vmatpush3.bf16.xpose.msra.mxu1 %v1877_v13 }
 0xb71   : > { %3194 = vmatprep.subr.bf16.mxu1 %v3378_v9 }
 0xb72   : > { %v1921_v14 = vpop.permute.xlu0 %1920 }
 0xb73   : > { %v1926_v15 = vsel %vm669_vm2, %v1921_v14, 0  ;;  %3179 = vmatmul.mubr.msk.bf16.vlgmr.msra.gmra.mxu0 %vm669_vm2, %v3785_v59 }
 0xb74   : > { %3189 = vmatpush3.bf16.xpose.msra.mxu0 %v1926_v15  ;;  %3190 = vmatprep.mubr.msk.bf16.mxu0 %vm3379_vm1, %v3378_v9 }
 0xb75   : > { %3200 = vmatprep.subr.bf16.mxu0 %v3378_v9 }
 0xb77   : > { %3185 = vmatmul.mubr.msk.bf16.vlgmr.msra.gmra.mxu1 %vm669_vm2, %v3792_v0 }
 0xb78   : > { %3196 = vmatprep.mubr.msk.bf16.mxu1 %vm3379_vm1, %v3378_v9 }
 0xb7b   : > { %3191 = vmatmul.mubr.msk.bf16.vlgmr.msra.gmra.mxu0 %vm669_vm2, %v3796_v5 }
 0xb7c   : > { %3202 = vmatprep.mubr.msk.bf16.mxu0 %vm3379_vm1, %v3378_v9 }
 0xc2b   : > { %v1815_v20 = vpop.f32.mrf.mxu1 }
 0xc2c   : > { %v1816_v21 = vadd.f32 %v1815_v20, %v3580_v6 }
 0xc2d   : > { %v3174_v22 = vpop.f32.mrf.mxu1 }
 0xc2e   : > { %v1968_v23 = vsel %vm669_vm2, %v1816_v21, -inf }
 0xc2f   : > { %v1818_v24 = vpop.f32.mrf.mxu1  ;;  %1969 = vmax.xlane.f32.xlu1 %v1968_v23 }
 0xc31   : > { %v3175_v26 = vpop.f32.mrf.mxu1 }
 0xc33   : > { %v1864_v29 = vpop.f32.mrf.mxu0 }
 0xc34   : > { %v1865_v25 = vadd.f32 %v1864_v29, %v3580_v6 }
 0xc35   : > { %v3180_v30 = vpop.f32.mrf.mxu0 }
 0xc36   : > { %v1971_v31 = vsel %vm669_vm2, %v1865_v25, -inf }
 0xc37   : > { %v1913_v34 = vpop.f32.mrf.mxu1  ;;  %1972 = vmax.xlane.f32.xlu0 %v1971_v31  ;;  %v1867_v36 = vpop.f32.mrf.mxu0 }
 0xc38   : > { %v1914_v37 = vadd.f32 %v1913_v34, %v3580_v6 }
 0xc39   : > { %v3181_v18 = vpop.f32.mrf.mxu0  ;;  %v3186_v17 = vpop.f32.mrf.mxu1 }
 0xc3a   : > { %v1974_v39 = vsel %vm669_vm2, %v1914_v37, -inf }
 0xc3b   : > { %v1916_v40 = vpop.f32.mrf.mxu1  ;;  %1975 = vmax.xlane.f32.xlu0 %v1974_v39  ;;  %v1962_v41 = vpop.f32.mrf.mxu0  ;;  %v2884_v39 = vld [vmem:[%s3987_s5 + $0x10] sm:$0xf] }
 0xc3c   : > { %v1963_v42 = vadd.f32 %v1962_v41, %v3580_v6  ;;  %v2221_v40 = vsel %vm916_vm3, %v2884_v39, 0  ;;  %v2885_v41 = vld [vmem:[%s3987_s5 + $0x14] sm:$0xf] }
 0xc3d   : > { %v3187_v43 = vpop.f32.mrf.mxu1  ;;  %v3192_v44 = vpop.f32.mrf.mxu0 }
 0xc3e   : > { %v1977_v45 = vsel %vm669_vm2, %v1963_v42, -inf  ;;  %v2886_v43 = vld [vmem:[%s3987_s5 + $0x18] sm:$0xf] }
 0xc3f   : > { %1978 = vmax.xlane.f32.xlu1 %v1977_v45  ;;  %v1965_v49 = vpop.f32.mrf.mxu0 }
 0xc40   : > { %v2313_v49 = vsel %vm916_vm3, %v2886_v43, 0 }
 0xc41   : > { %v3193_v38 = vpop.f32.mrf.mxu0 }
 0xc50   : > { %2064 = vrot.lane.b32.xlu1 %v3785_v59, %s3381_s11 }
 0xcb8   : > { %v1970_v46 = vpop.xlane.xlu1 %1969 }
 0xcb9   : > { %v1980_v50 = vsub.f32 %v1816_v21, %v1970_v46 }
 0xcbb   : > { %v1984_v51 = vmul.f32 1.442695, %v1980_v50 }
 0xcbd   : > { %3346 = vpow2.f32 %v1984_v51  ;;  %v2887_v51 = vld [vmem:[%s3987_s5 + $0x1c] sm:$0xf] }
 0xcc0   : > { %v1973_v52 = vpop.xlane.xlu0 %1972 }
 0xcc1   : > { %v1981_v55 = vsub.f32 %v1865_v25, %v1973_v52 }
 0xcc3   : > { %v1986_v56 = vmul.f32 1.442695, %v1981_v55 }
 0xcc4   : > { %v1976_v8 = vpop.xlane.xlu0 %1975 }
 0xcc5   : > { %3348 = vpow2.f32 %v1986_v56  ;;  %v1982_v10 = vsub.f32 %v1914_v37, %v1976_v8  ;;  %v2359_v56 = vsel %vm916_vm3, %v2887_v51, 0 }
 0xcc7   : > { %v1988_v53 = vmul.f32 1.442695, %v1982_v10 }
 0xcc8   : > { %v1979_v57 = vpop.xlane.xlu1 %1978 }
 0xcc9   : > { %v1983_v6 = vsub.f32 %v1963_v42, %v1979_v57  ;;  %v2267_v42 = vsel %vm916_vm3, %v2885_v41, 0 }
 0xcca   : > { %v3347_v58 = vpop.eup %3346 }
 0xccb   : > { %v1990_v60 = vmul.f32 1.442695, %v1983_v6  ;;  %v1992_v61 = vsel %vm669_vm2, %v3347_v58, 0.0 }
 0xccc   : > { %1993 = vadd.xlane.f32.xlu0 %v1992_v61  ;;  %v2065_v62 = vpop.permute.xlu1 %2064 }
 0xccd   : > { %3350 = vpow2.f32 %v1990_v60  ;;  %v2070_v2 = vsel %vm916_vm3, %v2065_v62, 0 }
 0xcce   : > { %3201 = vmatpush3.bf16.msra.mxu0 %v2070_v2  ;;  %3352 = vpow2.f32 %v1988_v53 }
 0xccf   : > { %3212 = vmatprep.subr.bf16.mxu0 %v3378_v9 }
 0xcd2   : > { %v3349_v59 = vpop.eup %3348 }
 0xcd3   : > { %v1995_v3 = vsel %vm669_vm2, %v3349_v59, 0.0 }
 0xcd4   : > { %1996 = vadd.xlane.f32.xlu1 %v1995_v3 }
 0xcda   : > { %v3351_v4 = vpop.eup %3350 }
 0xcdb   : > { %v2001_v7 = vsel %vm669_vm2, %v3351_v4, 0.0  ;;  %v3353_v11 = vpop.eup %3352 }
 0xcdc   : > { %2002 = vadd.xlane.f32.xlu1 %v2001_v7  ;;  %v1998_v54 = vsel %vm669_vm2, %v3353_v11, 0.0 }
 0xce2   : > { %2016 = vrot.lane.b32.xlu0 %v3775_v48, %s3381_s11 }
 0xced   : > { %2112 = vrot.lane.b32.xlu1 %v3792_v0, %s3381_s11 }
 0xd01   : > { %1999 = vadd.xlane.f32.xlu0 %v1998_v54 }
 0xd17   : > { %2160 = vrot.lane.b32.xlu0 %v3796_v5, %s3381_s11 }
 0xd55   : > { %v1994_v12 = vpop.xlane.xlu0 %1993 }
 0xd56   : > { %3354 = vrcp.f32 %v1994_v12 }
 0xd59   : > { %v2017_v13 = vpop.permute.xlu0 %2016 }
 0xd5a   : > { %v2022_v14 = vsel %vm916_vm3, %v2017_v13, 0 }
 0xd5b   : > { %3195 = vmatpush3.bf16.msra.mxu1 %v2022_v14 }
 0xd5c   : > { %3206 = vmatprep.subr.bf16.mxu1 %v3378_v9 }
 0xd5d   : > { %v1997_v48 = vpop.xlane.xlu1 %1996 }
 0xd5e   : > { %3356 = vrcp.f32 %v1997_v48 }
 0xd63   : > { %v3355_v15 = vpop.eup %3354 }
 0xd64   : > { %v2005_v0 = vmul.f32 %v3355_v15, %v3347_v58 }
 0xd65   : > { %v2003_v20 = vpop.xlane.xlu1 %2002 }
 0xd66   : > { %v2012_v21 = vpack.c.bf16 %v2005_v0, %v2005_v0  ;;  %3358 = vrcp.f32 %v2003_v20 }
 0xd68   : > { %3197 = vmatmul.mubr.msk.bf16.vlgmr.msra.gmra.mxu1 %vm669_vm2, %v2012_v21 }
 0xd69   : > { %v2113_v22 = vpop.permute.xlu1 %2112  ;;  %3208 = vmatprep.mubr.msk.bf16.mxu1 %vm3379_vm1, %v3378_v9 }
 0xd6a   : > { %v2118_v5 = vsel %vm916_vm3, %v2113_v22, 0 }
 0xd6b   : > { %v3357_v23 = vpop.eup %3356  ;;  %3207 = vmatpush3.bf16.msra.mxu1 %v2118_v5 }
 0xd6c   : > { %v2007_v24 = vmul.f32 %v3357_v23, %v3349_v59  ;;  %3218 = vmatprep.subr.bf16.mxu1 %v3378_v9 }
 0xd6e   : > { %v2013_v26 = vpack.c.bf16 %v2007_v24, %v2007_v24 }
 0xd70   : > { %3203 = vmatmul.mubr.msk.bf16.vlgmr.msra.gmra.mxu0 %vm669_vm2, %v2013_v26 }
 0xd71   : > { %3214 = vmatprep.mubr.msk.bf16.mxu0 %vm3379_vm1, %v3378_v9 }
 0xd73   : > { %v3359_v29 = vpop.eup %3358 }
 0xd74   : > { %v2011_v30 = vmul.f32 %v3359_v29, %v3351_v4 }
 0xd76   : > { %v2015_v36 = vpack.c.bf16 %v2011_v30, %v2011_v30 }
 0xd8a   : > { %v2000_v25 = vpop.xlane.xlu0 %1999 }
 0xd8b   : > { %3360 = vrcp.f32 %v2000_v25 }
 0xd8e   : > { %v2161_v31 = vpop.permute.xlu0 %2160 }
 0xd8f   : > { %v2166_v34 = vsel %vm916_vm3, %v2161_v31, 0  ;;  %v2411_v31 = vrot.slane %v3733_v28, %v397_v19  ;;  %v3312_v19 = vld [vmem:[%s3988_s6 + $0x18] sm:$0xff]  }
 0xd90   : > { %3213 = vmatpush3.bf16.msra.mxu0 %v2166_v34 }
 0xd91   : > { %3224 = vmatprep.subr.bf16.mxu0 %v3378_v9 }
 0xd93   : > { %3215 = vmatmul.mubr.msk.bf16.vlgmr.msra.gmra.mxu0 %vm669_vm2, %v2015_v36 }
 0xd94   : > { %3226 = vmatprep.mubr.msk.bf16.mxu0 %vm3379_vm1, %v3378_v9  ;;  %3225 = vmatpush3.bf16.msra.mxu0 %v2267_v42 }
 0xd95   : > { %3236 = vmatprep.subr.bf16.mxu0 %v3378_v9 }
 0xd98   : > { %v3361_v37 = vpop.eup %3360 }
 0xd99   : > { %v2009_v18 = vmul.f32 %v3361_v37, %v3353_v11 }
 0xd9b   : > { %v2014_v17 = vpack.c.bf16 %v2009_v18, %v2009_v18 }
 0xd9d   : > { %3209 = vmatmul.mubr.msk.bf16.vlgmr.msra.gmra.mxu1 %vm669_vm2, %v2014_v17 }
 0xd9e   : > { %3220 = vmatprep.mubr.msk.bf16.mxu1 %vm3379_vm1, %v3378_v9  ;;  %3219 = vmatpush3.bf16.msra.mxu1 %v2221_v40 }
 0xd9f   : > { %3230 = vmatprep.subr.bf16.mxu1 %v3378_v9 }
 0xe28   : > { %v2058_v44 = vpop.f32.mrf.mxu1 }
 0xe29   : > { %v2208_v45 = vpack.c.bf16 %v2058_v44, %v2058_v44 }
 0xe2a   : > { %v3198_v38 = vpop.f32.mrf.mxu1 }
 0xe2b   : > { %3221 = vmatmul.mubr.msk.bf16.vlgmr.msra.gmra.mxu1 %vm669_vm2, %v2208_v45 }
 0xe2c   : > { %v2061_v46 = vpop.f32.mrf.mxu1  ;;  %3231 = vmatpush3.bf16.msra.mxu1 %v2313_v49  ;;  %3232 = vmatprep.mubr.msk.bf16.mxu1 %vm3379_vm1, %v3378_v9  ;;  %v3313_v49 = vld [vmem:[%s3988_s6 + $0x10] sm:$0xff]  }
 0xe2d   : > { %3242 = vmatprep.subr.bf16.mxu1 %v3378_v9 }
 0xe2e   : > { %v3199_v50 = vpop.f32.mrf.mxu1 }
 0xe2f   : > { %v2430_v50 = vrot.slane %v3733_v28, %v1305_v63  ;;  %v3315_v63 = vld [vmem:[%s3989_s7 + $0x30] sm:$0xff]  }
 0xe30   : > { %v2106_v52 = vpop.f32.mrf.mxu0 }
 0xe31   : > { %v2209_v55 = vpack.c.bf16 %v2106_v52, %v2106_v52 }
 0xe32   : > { %v3204_v57 = vpop.f32.mrf.mxu0 }
 0xe33   : > { %3227 = vmatmul.mubr.msk.bf16.vlgmr.msra.gmra.mxu0 %vm669_vm2, %v2209_v55  ;;  %v2435_v55 = vrot.slane %v3733_v28, %v1324_v32  ;;  %v3316_v32 = vld [vmem:[%s3989_s7 + $0x28] sm:$0xff]  }
 0xe34   : > { %v2109_v6 = vpop.f32.mrf.mxu0  ;;  %3237 = vmatpush3.bf16.msra.mxu0 %v2359_v56  ;;  %3238 = vmatprep.mubr.msk.bf16.mxu0 %vm3379_vm1, %v3378_v9 }
 0xe35   : > { %3250 = vmatprep.subr.bf16.mxu0 %v3378_v9 }
 0xe36   : > { %v3205_v58 = vpop.f32.mrf.mxu0 }
 0xe37   : > { %v3314_v58 = vld [vmem:[%s3989_s7 + $0x38] sm:$0xff]  }
 0xe53   : > { %v2202_v60 = vpop.f32.mrf.mxu0 }
 0xe54   : > { %v2211_v61 = vpack.c.bf16 %v2202_v60, %v2202_v60  ;;  %v3317_v60 = vld [vmem:[%s3989_s7 + $0x20] sm:$0xff]  }
 0xe55   : > { %v3216_v62 = vpop.f32.mrf.mxu0 }
 0xe56   : > { %3239 = vmatmul.mubr.msk.bf16.vlgmr.msra.gmra.mxu0 %vm669_vm2, %v2211_v61  ;;  %v2446_v61 = vrot.slane %v3733_v28, %v1329_v33  ;;  %v2524_v33 = vrot.slane %v3733_v28, %v1339_v47  ;;  %v3318_v47 = vld [vmem:[%s3990_s8 + $0x8] sm:$0xff]  }
 0xe57   : > { %v2205_v2 = vpop.f32.mrf.mxu0  ;;  %3258 = vmatprep.mubr.msk.bf16.mxu0 %vm3379_vm1, %v3378_v9  ;;  %3251 = vmatpush3.bf16.msra.mxu0 %v3314_v58 }
 0xe58   : > { %3252 = vmatprep.subr.bf16.mxu0 %v3378_v9 }
 0xe59   : > { %v3217_v59 = vpop.f32.mrf.mxu0 }
 0xe5b   : > { %3253 = vmatpush3.bf16.msra.mxu0 %v3315_v63 }
 0xe5c   : > { %3254 = vmatprep.subr.bf16.mxu0 %v3378_v9 }
 0xe5d   : > { %v2154_v3 = vpop.f32.mrf.mxu1 }
 0xe5e   : > { %v2210_v4 = vpack.c.bf16 %v2154_v3, %v2154_v3 }
 0xe5f   : > { %v3210_v7 = vpop.f32.mrf.mxu1  ;;  %3255 = vmatpush3.bf16.msra.mxu0 %v3316_v32 }
 0xe60   : > { %3233 = vmatmul.mubr.msk.bf16.vlgmr.msra.gmra.mxu1 %vm669_vm2, %v2210_v4  ;;  %3256 = vmatprep.subr.bf16.mxu0 %v3378_v9 }
 0xe61   : > { %v2157_v8 = vpop.f32.mrf.mxu1  ;;  %3246 = vmatprep.mubr.msk.bf16.mxu1 %vm3379_vm1, %v3378_v9  ;;  %3243 = vmatpush3.bf16.msra.mxu1 %v3312_v19 }
 0xe62   : > { %3244 = vmatprep.subr.bf16.mxu1 %v3378_v9 }
 0xe63   : > { %v3211_v10 = vpop.f32.mrf.mxu1  ;;  %3257 = vmatpush3.bf16.msra.mxu0 %v3317_v60 }
 0xe65   : > { %3245 = vmatpush3.bf16.msra.mxu1 %v3313_v49 }
 0xe66   : > { %3262 = vmatprep.subr.bf16.mxu1 %v3378_v9 }
 0xeeb   : > { %v2257_v53 = vpop.f32.mrf.mxu1 }
 0xeec   : > { %v2401_v23 = vsel %vm375_vm0, %v2257_v53, 0.0 }
 0xeed   : > { %v3222_v11 = vpop.f32.mrf.mxu1 }
 0xeef   : > { %v2260_v54 = vpop.f32.mrf.mxu1 }
 0xef1   : > { %v3223_v12 = vpop.f32.mrf.mxu1 }
 0xef3   : > { %v2303_v13 = vpop.f32.mrf.mxu0 }
 0xef4   : > { %v2402_v5 = vsel %vm375_vm0, %v2303_v13, 0.0 }
 0xef5   : > { %v3228_v14 = vpop.f32.mrf.mxu0  ;;  %v2403_v24 = vadd.f32 %v2402_v5, %v2401_v23 }
 0xef7   : > { %v2306_v48 = vpop.f32.mrf.mxu0 }
 0xef9   : > { %v3229_v15 = vpop.f32.mrf.mxu0 }
 0xf16   : > { %v2395_v0 = vpop.f32.mrf.mxu0 }
 0xf17   : > { %v2406_v34 = vsel %vm375_vm0, %v2395_v0, 0.0 }
 0xf18   : > { %v3240_v20 = vpop.f32.mrf.mxu0 }
 0xf1a   : > { %v2398_v21 = vpop.f32.mrf.mxu0 }
 0xf1c   : > { %v3241_v22 = vpop.f32.mrf.mxu0 }
 0xf20   : > { %v2349_v26 = vpop.f32.mrf.mxu1 }
 0xf21   : > { %v2404_v29 = vsel %vm375_vm0, %v2349_v26, 0.0 }
 0xf22   : > { %v2405_v25 = vadd.f32 %v2404_v29, %v2403_v24  ;;  %v3234_v30 = vpop.f32.mrf.mxu1 }
 0xf24   : > { %v2407_v36 = vadd.f32 %v2406_v34, %v2405_v25  ;;  %v2352_v37 = vpop.f32.mrf.mxu1 }
 0xf26   : > { %v3235_v18 = vpop.f32.mrf.mxu1  ;;  %v2412_v17 = vadd.f32 %v2411_v31, %v2407_v36  ;;  %v3319_v31 = vld [vmem:[%s3990_s8] sm:$0xff]  }
 0xf27   : > { %v2609_v18 = vrot.slane %v3733_v28, %v1416_v1  ;;  %v370_v1 = vld [vmem:[%s3984_s2 + $0x10] sm:$0x3] }
 0xf28   : > { %v2413_v39 = vadd.f32 %v2412_v17, %v3740_v35 }
 0xf2a   : > { %v2414_v40 = vsel %vm375_vm0, %v2413_v39, 0.0 }
 0xf2b   : > { %2415 = vadd.xlane.f32.xlu1 %v2414_v40  ;;  %v2614_v40 = vrot.slane %v3733_v28, %v1502_v27 }
 0xfb4   : > { %v2416_v41 = vpop.xlane.xlu1 %2415 }
 0xfb5   : > { %v2417_v42 = vmul.f32 0.03125, %v2416_v41 }
 0xfb7   : > { %v2418_v43 = vsub.f32 %v2413_v39, %v2417_v42 }
 0xfb9   : > { %v2419_v44 = vmul.f32 %v2418_v43, %v2418_v43 }
 0xfbb   : > { %v2420_v45 = vsel %vm375_vm0, %v2419_v44, 0.0  ;;  %v3320_v44 = vld [vmem:[%s3991_s9 + $0x8] sm:$0xff]  }
 0xfbc   : > { %2421 = vadd.xlane.f32.xlu0 %v2420_v45 }
0x1045   : > { %v2422_v35 = vpop.xlane.xlu0 %2421 }
0x1046   : > { %v2423_v38 = vmul.f32 0.03125, %v2422_v35 }
0x1048   : > { %v2424_v46 = vadd.f32 1e-05, %v2423_v38 }
0x104a   : > { %3362 = vrsqrt.f32 %v2424_v46 }
0x1057   : > { %v3363_v51 = vpop.eup %3362 }
0x1058   : > { %v2426_v52 = vmul.f32 %v3363_v51, %v2418_v43 }
0x105a   : > { %v2431_v56 = vmul.f32 %v2430_v50, %v2426_v52 }
0x105c   : > { %v2436_v57 = vadd.f32 %v2435_v55, %v2431_v56 }
0x105e   : > { %v2437_v6 = vpack.c.bf16 %v2436_v57, %v2436_v57 }
0x1060   : > { %3247 = vmatmul.mubr.msk.bf16.vlgmr.msra.gmra.mxu1 %vm375_vm0, %v2437_v6 }
0x1061   : > { %3266 = vmatprep.mubr.msk.bf16.mxu1 %vm3379_vm1, %v3378_v9  ;;  %3263 = vmatpush3.bf16.msra.mxu1 %v3318_v47 }
0x1062   : > { %3264 = vmatprep.subr.bf16.mxu1 %v3378_v9 }
0x1065   : > { %3265 = vmatpush3.bf16.msra.mxu1 %v3319_v31 }
0x1066   : > { %3270 = vmatprep.subr.bf16.mxu1 %v3378_v9 }
0x1120   : > { %v2496_v62 = vpop.f32.mrf.mxu1 }
0x1121   : > { %v2497_v2 = vadd.f32 %v2496_v62, %v2446_v61 }
0x1122   : > { %v3248_v59 = vpop.f32.mrf.mxu1 }
0x1123   : > { %v2503_v3 = vmul.f32 0.044715, %v2497_v2  ;;  %v2502_v12 = vmul.f32 0.5, %v2497_v2 }
0x1124   : > { %v2499_v4 = vpop.f32.mrf.mxu1 }
0x1125   : > { %v2504_v7 = vmul.f32 %v2503_v3, %v2497_v2 }
0x1126   : > { %v3249_v8 = vpop.f32.mrf.mxu1 }
0x1127   : > { %v2505_v10 = vmul.f32 %v2504_v7, %v2497_v2 }
0x1129   : > { %v2506_v53 = vadd.f32 %v2505_v10, %v2497_v2 }
0x112b   : > { %v2507_v11 = vmul.f32 0.7978846, %v2506_v53 }
0x112d   : > { %3364 = vtanh.f32 %v2507_v11 }
0x113a   : > { %v3365_v54 = vpop.eup %3364 }
0x113b   : > { %v2509_v13 = vadd.f32 1.0, %v3365_v54 }
0x113d   : > { %v2510_v14 = vmul.f32 %v2509_v13, %v2502_v12 }
0x113f   : > { %v2511_v48 = vpack.c.bf16 %v2510_v14, %v2510_v14 }
0x1141   : > { %3259 = vmatmul.mubr.msk.bf16.vlgmr.msra.gmra.mxu0 %vm1442_vm4, %v2511_v48 }
0x1201   : > { %v2586_v15 = vpop.f32.mrf.mxu0 }
0x1202   : > { %v2587_v0 = vadd.f32 %v2586_v15, %v2524_v33 }
0x1203   : > { %v3260_v20 = vpop.f32.mrf.mxu0 }
0x1204   : > { %v2592_v21 = vadd.f32 %v2587_v0, %v2436_v57 }
0x1205   : > { %v2589_v22 = vpop.f32.mrf.mxu0 }
0x1206   : > { %v2593_v5 = vsel %vm375_vm0, %v2592_v21, 0.0 }
0x1207   : > { %2594 = vadd.xlane.f32.xlu0 %v2593_v5  ;;  %v3261_v23 = vpop.f32.mrf.mxu0 }
0x1290   : > { %v2595_v24 = vpop.xlane.xlu0 %2594 }
0x1291   : > { %v2596_v26 = vmul.f32 0.03125, %v2595_v24 }
0x1293   : > { %v2597_v29 = vsub.f32 %v2592_v21, %v2596_v26 }
0x1295   : > { %v2598_v25 = vmul.f32 %v2597_v29, %v2597_v29 }
0x1297   : > { %v2599_v30 = vsel %vm375_vm0, %v2598_v25, 0.0 }
0x1298   : > { %2600 = vadd.xlane.f32.xlu1 %v2599_v30 }
0x1321   : > { %v2601_v34 = vpop.xlane.xlu1 %2600 }
0x1322   : > { %v2602_v36 = vmul.f32 0.03125, %v2601_v34 }
0x1324   : > { %v2603_v37 = vadd.f32 1e-05, %v2602_v36 }
0x1326   : > { %3366 = vrsqrt.f32 %v2603_v37 }
0x1333   : > { %v3367_v17 = vpop.eup %3366 }
0x1334   : > { %v2605_v39 = vmul.f32 %v3367_v17, %v2597_v29 }
0x1336   : > { %v2610_v41 = vmul.f32 %v2609_v18, %v2605_v39 }
0x1338   : > { %v2615_v42 = vadd.f32 %v2614_v40, %v2610_v41 }
0x133a   : > { %v2616_v43 = vpack.c.bf16 %v2615_v42, %v2615_v42 }
0x133c   : > { %3267 = vmatmul.mubr.msk.bf16.vlgmr.msra.gmra.mxu1 %vm375_vm0, %v2616_v43 }
0x133d   : > { %3274 = vmatprep.mubr.msk.bf16.mxu1 %vm3379_vm1, %v3378_v9  ;;  %3271 = vmatpush3.bf16.msra.mxu1 %v3320_v44 }
0x133e   : > { %3272 = vmatprep.subr.bf16.mxu1 %v3378_v9  ;;  %v2695_v9 = vrot.slane %v370_v1, 1 }
0x1341   : > { %3273 = vmatpush3.bf16.msra.mxu1 %v3321_v16 }
0x13fc   : > { %v2670_v27 = vpop.f32.mrf.mxu1 }
0x13fd   : > { %v2671_v28 = vadd.f32 %v2670_v27, %v370_v1 }
0x13fe   : > { %v3268_v45 = vpop.f32.mrf.mxu1 }
0x13ff   : > { %3368 = vtanh.f32 %v2671_v28 }
0x1400   : > { %v2673_v19 = vpop.f32.mrf.mxu1 }
0x1402   : > { %v3269_v49 = vpop.f32.mrf.mxu1 }
0x140c   : > { %v3369_v35 = vpop.eup %3368 }
0x140d   : > { %v2677_v38 = vpack.c.bf16 %v3369_v35, %v3369_v35 }
0x140f   : > { %3275 = vmatmul.mubr.msk.bf16.vlgmr.msra.gmra.mxu1 %vm375_vm0, %v2677_v38 }
0x14cf   : > { %v2734_v46 = vpop.f32.mrf.mxu1 }
0x14d0   : > { %v2735_v50 = vadd.f32 %v2734_v46, %v2695_v9 }
0x14d1   : > { %v3276_v51 = vpop.f32.mrf.mxu1 }
0x14d2   : > { %2741 = vst.msk [vmem:[%s366_s25] sm:$0x1] %vm2740_vm5, %v2735_v50 }
0x14d3   : > { %v2737_v52 = vpop.f32.mrf.mxu1 }
0x14d5   : > { %v3277_v55 = vpop.f32.mrf.mxu1 }
0x14d6 PF: > { %s20_s13 = sadd.s32 1, %s3376_s13  }
0x14d7   : > { %p17_p4 = scmp.ge.s32.totalorder %s20_s13, 4  }
0x14d9   :  { %19 = sbr.rel (!%p17_p4) target bundleno = 1 (0x1), region = 98 }

</bundles_post_ra>
